<compile_context>
chip_gen: v5e
topology: v5e:2x2
jax: 0.10.0
libtpu: 0.0.40
codegen_flags: <defaults>
</compile_context>

<pallas_src>
import jax
import jax.numpy as jnp
from jax.experimental import pallas as pl
from jax.experimental.pallas import tpu as pltpu

EMBEDDING_VECTOR_SIZE = 7
IN_DIM = EMBEDDING_VECTOR_SIZE + 1   # 8
HID = 256
OUT_DIM = 1
OUT_PAD = 128                        # padded w4 width (MXU-friendly); only col 0 is stored
BN_EPS = 1e-5
TM_DEFAULT = 1024                    # batch tile (sweepable); tiny vs VMEM on all gens


def _mlp_kernel(x_ref,
                w1_ref, b1_ref,
                w2_ref, b2_ref,
                w3_ref, b3_ref,
                w4_ref, b4_ref,
                o_ref):
    # Block 1: x tile is already bf16; accumulate in f32 on the MXU.
    h = jnp.dot(x_ref[...], w1_ref[...],
                preferred_element_type=jnp.float32) + b1_ref[...]
    h = jnp.maximum(h, 0.0)

    # Block 2
    h = jnp.dot(h.astype(jnp.bfloat16), w2_ref[...],
                preferred_element_type=jnp.float32) + b2_ref[...]
    h = jnp.maximum(h, 0.0)

    # Block 3
    h = jnp.dot(h.astype(jnp.bfloat16), w3_ref[...],
                preferred_element_type=jnp.float32) + b3_ref[...]
    h = jnp.maximum(h, 0.0)

    # Final Linear: padded (256,128) weight keeps the MXU happy; only the real
    # column 0 is biased and stored (narrow store, narrow HBM writeback).
    out = jnp.dot(h.astype(jnp.bfloat16), w4_ref[...],
                  preferred_element_type=jnp.float32)
    o_ref[...] = (out[:, :OUT_DIM] + b4_ref[...]).astype(o_ref.dtype)


def net_forward(x, pp, tm=TM_DEFAULT):
    """x: (N, 8) float32 (or bf16).  pp: prepped (folded) params.  Returns (N, 1) f32."""
    n = x.shape[0]
    x = x.astype(jnp.bfloat16)       # halve input DMA; kernel consumes bf16 directly

    # Batch tile: for n <= tm, one block covering the whole batch (block dim ==
    # full array dim satisfies the layout rule even for odd n).  For n > tm,
    # the last block may be ragged; Pallas masks the overhang on store and the
    # math is row-independent, so that is safe.
    tm_eff = n if n <= tm else tm
    grid = (pl.cdiv(n, tm_eff),)

    def tile_map(i):       # batch-tiled operands
        return (i, 0)

    def resident_map(i):   # weights/biases: same block every step -> stay in VMEM
        return (0, 0)

    w1, b1 = pp["w1"], pp["b1"]
    w2, b2 = pp["w2"], pp["b2"]
    w3, b3 = pp["w3"], pp["b3"]
    w4, b4 = pp["w4"], pp["b4"]

    in_specs = [
        pl.BlockSpec((tm_eff, IN_DIM), tile_map),
        pl.BlockSpec(w1.shape, resident_map),
        pl.BlockSpec(b1.shape, resident_map),
        pl.BlockSpec(w2.shape, resident_map),
        pl.BlockSpec(b2.shape, resident_map),
        pl.BlockSpec(w3.shape, resident_map),
        pl.BlockSpec(b3.shape, resident_map),
        pl.BlockSpec(w4.shape, resident_map),
        pl.BlockSpec(b4.shape, resident_map),
    ]
    out_spec = pl.BlockSpec((tm_eff, OUT_DIM), tile_map)

    out = pl.pallas_call(
        _mlp_kernel,
        out_shape=jax.ShapeDtypeStruct((n, OUT_DIM), jnp.float32),
        grid=grid,
        in_specs=in_specs,
        out_specs=out_spec,
        compiler_params=pltpu.CompilerParams(
            dimension_semantics=("parallel",),   # megacore sharding on v7x
            vmem_limit_bytes=32 * 1024 * 1024,   # safe on all gens (<= v7x 64 MiB/TC)
        ),
    )(x, w1, b1, w2, b2, w3, b3, w4, b4)

    return out


def init_raw_params(key):
    """Deterministic init mirroring the shapes in Net.__init__ (weights stored
    as (in, out), i.e. the transpose of PyTorch's (out, in))."""
    ks = jax.random.split(key, 20)

    def linear(kw, kb, fan_in, fan_out):
        bound = 1.0 / float(fan_in) ** 0.5
        w = jax.random.uniform(kw, (fan_in, fan_out), jnp.float32, -bound, bound)
        b = jax.random.uniform(kb, (1, fan_out), jnp.float32, -bound, bound)
        return w, b

    def batchnorm(kg, kb2, km, kv, feat):
        gamma = 1.0 + 0.1 * jax.random.normal(kg, (1, feat), jnp.float32)
        beta = 0.1 * jax.random.normal(kb2, (1, feat), jnp.float32)
        mean = 0.1 * jax.random.normal(km, (1, feat), jnp.float32)
        var = 1.0 + 0.1 * jax.random.uniform(kv, (1, feat), jnp.float32)
        return gamma, beta, mean, var

    w1, b1 = linear(ks[0], ks[1], IN_DIM, HID)
    bn1 = batchnorm(ks[2], ks[3], ks[4], ks[5], HID)
    w2, b2 = linear(ks[6], ks[7], HID, HID)
    bn2 = batchnorm(ks[8], ks[9], ks[10], ks[11], HID)
    w3, b3 = linear(ks[12], ks[13], HID, HID)
    bn3 = batchnorm(ks[14], ks[15], ks[16], ks[17], HID)
    w4, b4 = linear(ks[18], ks[19], HID, OUT_DIM)

    return dict(w1=w1, b1=b1, bn1=bn1,
                w2=w2, b2=b2, bn2=bn2,
                w3=w3, b3=b3, bn3=bn3,
                w4=w4, b4=b4)


def prep_params(raw):
    """Fold inference-mode BatchNorm + Linear bias into the weights, cast the
    matmul weights to bf16, and pad the final-layer weight to 128 columns."""
    # TODO(synk): training-mode BatchNorm1d (batch statistics) has no clean
    # single-pass Pallas equivalent here; inference (running-stats) form is used.
    def fold(w, b, bn):
        gamma, beta, mean, var = bn
        scale = gamma / jnp.sqrt(var + BN_EPS)          # (1, out)
        shift = beta - mean * scale
        w_f = (w * scale).astype(jnp.bfloat16)          # scale each output column
        b_f = (b * scale + shift).astype(jnp.float32)
        return w_f, b_f

    w1, b1 = fold(raw["w1"], raw["b1"], raw["bn1"])
    w2, b2 = fold(raw["w2"], raw["b2"], raw["bn2"])
    w3, b3 = fold(raw["w3"], raw["b3"], raw["bn3"])

    w4 = jnp.zeros((HID, OUT_PAD), jnp.float32).at[:, :OUT_DIM].set(raw["w4"])
    w4 = w4.astype(jnp.bfloat16)
    b4 = raw["b4"].astype(jnp.float32)                  # (1, 1), added post-slice

    return dict(w1=w1, b1=b1, w2=w2, b2=b2, w3=w3, b3=b3, w4=w4, b4=b4)


def reference_forward(x, pp):
    """Pure-JAX reference replicating the kernel math (bf16 matmuls, f32 acc)."""
    bf = jnp.bfloat16
    h = jnp.maximum(jnp.dot(x.astype(bf), pp["w1"],
                            preferred_element_type=jnp.float32) + pp["b1"], 0.0)
    h = jnp.maximum(jnp.dot(h.astype(bf), pp["w2"],
                            preferred_element_type=jnp.float32) + pp["b2"], 0.0)
    h = jnp.maximum(jnp.dot(h.astype(bf), pp["w3"],
                            preferred_element_type=jnp.float32) + pp["b3"], 0.0)
    out = jnp.dot(h.astype(bf), pp["w4"],
                  preferred_element_type=jnp.float32)[:, :OUT_DIM] + pp["b4"]
    return out


if __name__ == "__main__":
    key = jax.random.PRNGKey(0)
    kx, kp = jax.random.split(key)

    N = 300  # small batch, not a multiple of 8 -> exercises the ragged-tile path
    x = jax.random.normal(kx, (N, IN_DIM), jnp.float32)

    raw = init_raw_params(kp)
    pp = prep_params(raw)

    out = net_forward(x, pp)
    out = jax.block_until_ready(out)

    ref = reference_forward(x, pp)
    assert out.shape == (N, OUT_DIM)
    assert jnp.allclose(out, ref, atol=1e-3, rtol=1e-3), "mismatch vs reference"

    print("KERNEL_OK")
</pallas_src>

<mosaic_0001>
module attributes {stable_mosaic.version = 11 : i64} {
  func.func @_mlp_kernel(%arg0: i32, %arg1: memref<300x8xbf16, #tpu.memory_space<vmem>>, %arg2: memref<8x256xbf16, #tpu.memory_space<vmem>>, %arg3: memref<1x256xf32, #tpu.memory_space<vmem>>, %arg4: memref<256x256xbf16, #tpu.memory_space<vmem>>, %arg5: memref<1x256xf32, #tpu.memory_space<vmem>>, %arg6: memref<256x256xbf16, #tpu.memory_space<vmem>>, %arg7: memref<1x256xf32, #tpu.memory_space<vmem>>, %arg8: memref<256x128xbf16, #tpu.memory_space<vmem>>, %arg9: memref<1x1xf32, #tpu.memory_space<vmem>>, %arg10: memref<300x1xf32, #tpu.memory_space<vmem>>) attributes {dimension_semantics = [#tpu.dimension_semantics<parallel>], iteration_bounds = array<i64: 1>, scalar_prefetch = 0 : i64, scratch_operands = 0 : i64, tpu.core_type = #tpu.core_type<tc>, window_params = [{transform_indices = @transform_0, window_bounds = array<i64: 300, 8>}, {pipeline_mode = #tpu.pipeline_mode<synchronous>, transform_indices = @transform_1, window_bounds = array<i64: 8, 256>}, {pipeline_mode = #tpu.pipeline_mode<synchronous>, transform_indices = @transform_2, window_bounds = array<i64: 1, 256>}, {pipeline_mode = #tpu.pipeline_mode<synchronous>, transform_indices = @transform_3, window_bounds = array<i64: 256, 256>}, {pipeline_mode = #tpu.pipeline_mode<synchronous>, transform_indices = @transform_4, window_bounds = array<i64: 1, 256>}, {pipeline_mode = #tpu.pipeline_mode<synchronous>, transform_indices = @transform_5, window_bounds = array<i64: 256, 256>}, {pipeline_mode = #tpu.pipeline_mode<synchronous>, transform_indices = @transform_6, window_bounds = array<i64: 1, 256>}, {pipeline_mode = #tpu.pipeline_mode<synchronous>, transform_indices = @transform_7, window_bounds = array<i64: 256, 128>}, {pipeline_mode = #tpu.pipeline_mode<synchronous>, transform_indices = @transform_8, window_bounds = array<i64: 1, 1>}, {transform_indices = @transform_9, window_bounds = array<i64: 300, 1>}]} {
    %c0 = arith.constant 0 : index
    %c0_0 = arith.constant 0 : index
    %0 = vector.load %arg1[%c0, %c0_0] : memref<300x8xbf16, #tpu.memory_space<vmem>>, vector<300x8xbf16>
    %c0_1 = arith.constant 0 : index
    %c0_2 = arith.constant 0 : index
    %1 = vector.load %arg2[%c0_1, %c0_2] : memref<8x256xbf16, #tpu.memory_space<vmem>>, vector<8x256xbf16>
    %cst = arith.constant dense<0.000000e+00> : vector<300x256xf32>
    %2 = tpu.matmul %0, %1, %cst {dimension_numbers = #tpu.dot_dimension_numbers<[1], [0], [0], [1], [0, 0, 1, 1], [], []>} : vector<300x8xbf16>, vector<8x256xbf16>, vector<300x256xf32> -> vector<300x256xf32>
    %c0_3 = arith.constant 0 : index
    %c0_4 = arith.constant 0 : index
    %3 = vector.load %arg3[%c0_3, %c0_4] : memref<1x256xf32, #tpu.memory_space<vmem>>, vector<1x256xf32>
    %4 = vector.broadcast %3 : vector<1x256xf32> to vector<300x256xf32>
    %5 = arith.addf %2, %4 : vector<300x256xf32>
    %cst_5 = arith.constant 0.000000e+00 : f32
    %6 = vector.broadcast %cst_5 : f32 to vector<300x256xf32>
    %7 = arith.maximumf %5, %6 : vector<300x256xf32>
    %8 = arith.truncf %7 : vector<300x256xf32> to vector<300x256xbf16>
    %c0_6 = arith.constant 0 : index
    %c0_7 = arith.constant 0 : index
    %9 = vector.load %arg4[%c0_6, %c0_7] : memref<256x256xbf16, #tpu.memory_space<vmem>>, vector<256x256xbf16>
    %cst_8 = arith.constant dense<0.000000e+00> : vector<300x256xf32>
    %10 = tpu.matmul %8, %9, %cst_8 {dimension_numbers = #tpu.dot_dimension_numbers<[1], [0], [0], [1], [0, 0, 1, 1], [], []>} : vector<300x256xbf16>, vector<256x256xbf16>, vector<300x256xf32> -> vector<300x256xf32>
    %c0_9 = arith.constant 0 : index
    %c0_10 = arith.constant 0 : index
    %11 = vector.load %arg5[%c0_9, %c0_10] : memref<1x256xf32, #tpu.memory_space<vmem>>, vector<1x256xf32>
    %12 = vector.broadcast %11 : vector<1x256xf32> to vector<300x256xf32>
    %13 = arith.addf %10, %12 : vector<300x256xf32>
    %cst_11 = arith.constant 0.000000e+00 : f32
    %14 = vector.broadcast %cst_11 : f32 to vector<300x256xf32>
    %15 = arith.maximumf %13, %14 : vector<300x256xf32>
    %16 = arith.truncf %15 : vector<300x256xf32> to vector<300x256xbf16>
    %c0_12 = arith.constant 0 : index
    %c0_13 = arith.constant 0 : index
    %17 = vector.load %arg6[%c0_12, %c0_13] : memref<256x256xbf16, #tpu.memory_space<vmem>>, vector<256x256xbf16>
    %cst_14 = arith.constant dense<0.000000e+00> : vector<300x256xf32>
    %18 = tpu.matmul %16, %17, %cst_14 {dimension_numbers = #tpu.dot_dimension_numbers<[1], [0], [0], [1], [0, 0, 1, 1], [], []>} : vector<300x256xbf16>, vector<256x256xbf16>, vector<300x256xf32> -> vector<300x256xf32>
    %c0_15 = arith.constant 0 : index
    %c0_16 = arith.constant 0 : index
    %19 = vector.load %arg7[%c0_15, %c0_16] : memref<1x256xf32, #tpu.memory_space<vmem>>, vector<1x256xf32>
    %20 = vector.broadcast %19 : vector<1x256xf32> to vector<300x256xf32>
    %21 = arith.addf %18, %20 : vector<300x256xf32>
    %cst_17 = arith.constant 0.000000e+00 : f32
    %22 = vector.broadcast %cst_17 : f32 to vector<300x256xf32>
    %23 = arith.maximumf %21, %22 : vector<300x256xf32>
    %24 = arith.truncf %23 : vector<300x256xf32> to vector<300x256xbf16>
    %c0_18 = arith.constant 0 : index
    %c0_19 = arith.constant 0 : index
    %25 = vector.load %arg8[%c0_18, %c0_19] : memref<256x128xbf16, #tpu.memory_space<vmem>>, vector<256x128xbf16>
    %cst_20 = arith.constant dense<0.000000e+00> : vector<300x128xf32>
    %26 = tpu.matmul %24, %25, %cst_20 {dimension_numbers = #tpu.dot_dimension_numbers<[1], [0], [0], [1], [0, 0, 1, 1], [], []>} : vector<300x256xbf16>, vector<256x128xbf16>, vector<300x128xf32> -> vector<300x128xf32>
    %27 = vector.extract_strided_slice %26 {offsets = [0, 0], sizes = [300, 1], strides = [1, 1]} : vector<300x128xf32> to vector<300x1xf32>
    %c0_21 = arith.constant 0 : index
    %c0_22 = arith.constant 0 : index
    %28 = vector.load %arg9[%c0_21, %c0_22] : memref<1x1xf32, #tpu.memory_space<vmem>>, vector<1x1xf32>
    %29 = vector.broadcast %28 : vector<1x1xf32> to vector<300x1xf32>
    %30 = arith.addf %27, %29 : vector<300x1xf32>
    %c0_23 = arith.constant 0 : index
    %c0_24 = arith.constant 0 : index
    %31 = vector.load %arg10[%c0_23, %c0_24] : memref<300x1xf32, #tpu.memory_space<vmem>>, vector<300x1xf32>
    tpu.vector_store %arg10[%c0_23, %c0_24], %30 {strides = array<i32>} : memref<300x1xf32, #tpu.memory_space<vmem>>, vector<300x1xf32>,
    return
  }
  func.func @transform_0(%arg0: i32) -> (i32, i32) {
    %c0_i32 = arith.constant 0 : i32
    %c0_i32_0 = arith.constant 0 : i32
    return %arg0, %c0_i32 : i32, i32
  }
  func.func @transform_1(%arg0: i32) -> (i32, i32) {
    %c0_i32 = arith.constant 0 : i32
    %c0_i32_0 = arith.constant 0 : i32
    %c0_i32_1 = arith.constant 0 : i32
    return %c0_i32, %c0_i32_0 : i32, i32
  }
  func.func @transform_2(%arg0: i32) -> (i32, i32) {
    %c0_i32 = arith.constant 0 : i32
    %c0_i32_0 = arith.constant 0 : i32
    %c0_i32_1 = arith.constant 0 : i32
    return %c0_i32, %c0_i32_0 : i32, i32
  }
  func.func @transform_3(%arg0: i32) -> (i32, i32) {
    %c0_i32 = arith.constant 0 : i32
    %c0_i32_0 = arith.constant 0 : i32
    %c0_i32_1 = arith.constant 0 : i32
    return %c0_i32, %c0_i32_0 : i32, i32
  }
  func.func @transform_4(%arg0: i32) -> (i32, i32) {
    %c0_i32 = arith.constant 0 : i32
    %c0_i32_0 = arith.constant 0 : i32
    %c0_i32_1 = arith.constant 0 : i32
    return %c0_i32, %c0_i32_0 : i32, i32
  }
  func.func @transform_5(%arg0: i32) -> (i32, i32) {
    %c0_i32 = arith.constant 0 : i32
    %c0_i32_0 = arith.constant 0 : i32
    %c0_i32_1 = arith.constant 0 : i32
    return %c0_i32, %c0_i32_0 : i32, i32
  }
  func.func @transform_6(%arg0: i32) -> (i32, i32) {
    %c0_i32 = arith.constant 0 : i32
    %c0_i32_0 = arith.constant 0 : i32
    %c0_i32_1 = arith.constant 0 : i32
    return %c0_i32, %c0_i32_0 : i32, i32
  }
  func.func @transform_7(%arg0: i32) -> (i32, i32) {
    %c0_i32 = arith.constant 0 : i32
    %c0_i32_0 = arith.constant 0 : i32
    %c0_i32_1 = arith.constant 0 : i32
    return %c0_i32, %c0_i32_0 : i32, i32
  }
  func.func @transform_8(%arg0: i32) -> (i32, i32) {
    %c0_i32 = arith.constant 0 : i32
    %c0_i32_0 = arith.constant 0 : i32
    %c0_i32_1 = arith.constant 0 : i32
    return %c0_i32, %c0_i32_0 : i32, i32
  }
  func.func @transform_9(%arg0: i32) -> (i32, i32) {
    %c0_i32 = arith.constant 0 : i32
    %c0_i32_0 = arith.constant 0 : i32
    return %arg0, %c0_i32 : i32, i32
  }
}

</mosaic_0001>

<bundles_post_ra>
// kernel: tpu_custom_call.1
= control target key start
LH: loop header
LB: loop body
LE: loop exit
PB: predicated region body
PF: predicated region fallthrough
CT: control target
= control target key end

     0   :  { %s4090_s0 = inlined_call_operand.vmem [shape: bf16[300,8], index: 0, kind: input, shape index: {}]   ;;  %s4091_s1 = inlined_call_operand.vmem [shape: bf16[8,256], index: 1, kind: input, shape index: {}]   ;;  %s4092_s2 = inlined_call_operand.vmem [shape: f32[1,256], index: 2, kind: input, shape index: {}]   ;;  %s4093_s3 = inlined_call_operand.hbm [shape: bf16[256,256], index: 3, kind: input, shape index: {}]   ;;  %s4094_s4 = inlined_call_operand.vmem [shape: f32[1,256], index: 4, kind: input, shape index: {}]   ;;  %s4095_s5 = inlined_call_operand.hbm [shape: bf16[256,256], index: 5, kind: input, shape index: {}]   ;;  %s4096_s6 = inlined_call_operand.vmem [shape: f32[1,256], index: 6, kind: input, shape index: {}]   ;;  %s4097_s7 = inlined_call_operand.vmem [shape: bf16[256,128], index: 7, kind: input, shape index: {}]   ;;  %s4098_s8 = inlined_call_operand.<no memory space> [shape: f32[1,1], index: 8, kind: input, shape index: {}]   ;;  %s4099_s9 = inlined_call_operand.vmem [shape: f32[300,1], index: 9, kind: output, shape index: {}]  }
   0x1   :  { %v14_v0 = vstv %s4098_s8 }
   0x2   :  { %15 = vst [vmem:[#allocation2] sm:$0x1] %v14_v0 }
   0x3   :  { %16 = vsyncpa [#allocation4], 0  ;;  %s28_s13 = sshll.u32 %s4093_s3, 4  ;;  %s29_s13 = int_to_ptr.hbm [resolvable:$true] %s28_s13 }
   0x4   :  { %17 = vsyncpa [#allocation6], 0  ;;  %s3069_s14 = smov [#allocation3]   ;;  %s43_s18 = sshll.u32 %s4095_s5, 4  ;;  %s44_s18 = int_to_ptr.hbm [resolvable:$true] %s43_s18 }
   0x5   :  { %s30_s15 = sshll.u32 %s3069_s14, 4  ;;  %s3070_s19 = smov 128   ;;  %s31_s15 = int_to_ptr.vmem [resolvable:$true] %s30_s15 }
   0x6   :  { %s3071_s20 = smov 8   ;;  %s3072_s8 = smov [#allocation5]  }
   0x7   :  { %36 = dma.hbm_to_vmem [thread:$0]  %s29_s13, 4096, %s31_s15, [#allocation4], %s3070_s19, %s3070_s19, %s3071_s20  }
   0x8   :  { %s45_s21 = sshll.u32 %s3072_s8, 4  ;;  %s46_s21 = int_to_ptr.vmem [resolvable:$true] %s45_s21 }
   0x9   :  { %51 = dma.hbm_to_vmem [thread:$0]  %s44_s18, 4096, %s46_s21, [#allocation6], %s3070_s19, %s3070_s19, %s3071_s20  }
   0xa   :  { %3065 = dma.done.wait [#allocation4], 4096  }
   0xb   :  { %3066 = vsyncadd [#allocation4], 4294963200 }
   0xc   :  { %3067 = dma.done.wait [#allocation6], 4096  }
   0xd   :  { %3068 = vsyncadd [#allocation6], 4294963200  ;;  %v105_v1 = vld [vmem:[%s4091_s1] sm:$0xff]  ;;  %v2946_v2 = vld [vmem:[#allocation3 + $0x74] sm:$0xf]  ;;  %vm270_vm0 = vcmask 1043456  }
   0xe   :  { %v208_v3 = vunpack.c.l.b16 %v105_v1  ;;  %v209_v4 = vunpack.c.h.b16 %v105_v1  ;;  %v2653_v5 = vld [vmem:[#allocation3 + $0x78] sm:$0xf0]  ;;  %v2962_v6 = vld [vmem:[#allocation3 + $0xf4] sm:$0xf]  ;;  %vm212_vm1 = vcmask 64512   ;;  %v2914_v21 = vld [vmem:[%s4090_s0 + $0x8] sm:$0xff] }
   0xf   :  { %v2717_v7 = vld [vmem:[#allocation3 + $0xf8] sm:$0xf0]  ;;  %v2656_v10 = vor.u32 %v2946_v2, %v2653_v5  ;;  %v2944_v15 = vld [vmem:[#allocation3 + $0x64] sm:$0xf]  ;;  %v2645_v16 = vld [vmem:[#allocation3 + $0x68] sm:$0xf0] }
  0x10   :  { %v210_v8 = vpack.c.b16 %v208_v3, %v208_v3  ;;  %v211_v9 = vpack.c.b16 %v209_v4, %v209_v4  ;;  %v2720_v11 = vor.u32 %v2962_v6, %v2717_v7  ;;  %v2913_v14 = vld [vmem:[%s4090_s0] sm:$0xff]  ;;  %v2648_v18 = vor.u32 %v2944_v15, %v2645_v16  ;;  %v2709_v19 = vld [vmem:[#allocation3 + $0xe8] sm:$0xf0]  ;;  %v2942_v23 = vld [vmem:[#allocation3 + $0x54] sm:$0xf] }
  0x11   :  { %v2960_v17 = vld [vmem:[#allocation3 + $0xe4] sm:$0xf]  ;;  %v2915_v22 = vld [vmem:[%s4090_s0 + $0x10] sm:$0xff]  ;;  %v2637_v24 = vld [vmem:[#allocation3 + $0x58] sm:$0xf0]  ;;  %vm2433_vm2 = vcmask 7168  }
  0x12   :  { %v272_v12 = vsel %vm270_vm0, %v210_v8, 0  ;;  %v275_v13 = vsel %vm270_vm0, %v211_v9, 0  ;;  %v2712_v20 = vor.u32 %v2960_v17, %v2709_v19  ;;  %v2958_v25 = vld [vmem:[#allocation3 + $0xd4] sm:$0xf]  ;;  %v2640_v26 = vor.u32 %v2942_v23, %v2637_v24  ;;  %v2701_v27 = vld [vmem:[#allocation3 + $0xd8] sm:$0xf0] }
  0x13   :  { %284 = vmatpush.bf16.msra.mxu0 %v272_v12  ;;  %388 = vmatpush.bf16.msra.mxu1 %v275_v13  ;;  %v2704_v28 = vor.u32 %v2958_v25, %v2701_v27  ;;  %v2916_v29 = vld [vmem:[%s4090_s0 + $0x18] sm:$0xff]  ;;  %v2917_v30 = vld [vmem:[%s4090_s0 + $0x20] sm:$0xff]  ;;  %v2651_v31 = vld [vmem:[#allocation3 + $0x70] sm:$0xf]  ;;  %vm2471_vm3 = vcmask 3072  }
  0x14   :  { %v2947_v32 = vld [vmem:[#allocation3 + $0x74] sm:$0xf0]  ;;  %v2715_v33 = vld [vmem:[#allocation3 + $0xf0] sm:$0xf]  ;;  %v2918_v37 = vld [vmem:[%s4090_s0 + $0x28] sm:$0xff] }
  0x15   :  { %v2652_v34 = vor.u32 %v2947_v32, %v2651_v31  ;;  %v2963_v35 = vld [vmem:[#allocation3 + $0xf4] sm:$0xf0]  ;;  %v2643_v38 = vld [vmem:[#allocation3 + $0x60] sm:$0xf]  ;;  %v2945_v39 = vld [vmem:[#allocation3 + $0x64] sm:$0xf0] }
  0x16   :  { %2555 = vmatmul.msk.bf16.vlgmr.msra.gmra.mxu0 %vm212_vm1, %v2913_v14  ;;  %2574 = vmatmul.msk.bf16.vlgmr.msra.gmra.mxu1 %vm212_vm1, %v2913_v14  ;;  %v2716_v36 = vor.u32 %v2963_v35, %v2715_v33  ;;  %v2707_v40 = vld [vmem:[#allocation3 + $0xe0] sm:$0xf]  ;;  %v2644_v41 = vor.u32 %v2945_v39, %v2643_v38  ;;  %v2961_v42 = vld [vmem:[#allocation3 + $0xe4] sm:$0xf0]  ;;  %v2940_v44 = vld [vmem:[#allocation3 + $0x44] sm:$0xf] }
  0x17   :  { %1005 = vmatpush.bf16.msrb.mxu0 %v2656_v10  ;;  %1109 = vmatpush.bf16.msrb.mxu1 %v2720_v11  ;;  %v2708_v43 = vor.u32 %v2961_v42, %v2707_v40  ;;  %v2629_v45 = vld [vmem:[#allocation3 + $0x48] sm:$0xf0]  ;;  %v2956_v46 = vld [vmem:[#allocation3 + $0xc4] sm:$0xf]  ;;  %v2635_v49 = vld [vmem:[#allocation3 + $0x50] sm:$0xf] }
  0x18   :  { %797 = vmatpush.bf16.msra.mxu2 %v2652_v34  ;;  %901 = vmatpush.bf16.msra.mxu3 %v2716_v36  ;;  %v2632_v47 = vor.u32 %v2940_v44, %v2629_v45  ;;  %v2693_v48 = vld [vmem:[#allocation3 + $0xc8] sm:$0xf0]  ;;  %v2943_v50 = vld [vmem:[#allocation3 + $0x54] sm:$0xf0]  ;;  %v2699_v53 = vld [vmem:[#allocation3 + $0xd0] sm:$0xf] }
  0x19   :  { %v2696_v51 = vor.u32 %v2956_v46, %v2693_v48  ;;  %v2636_v52 = vor.u32 %v2943_v50, %v2635_v49  ;;  %v2959_v54 = vld [vmem:[#allocation3 + $0xd4] sm:$0xf0]  ;;  %v2627_v55 = vld [vmem:[#allocation3 + $0x40] sm:$0xf]  ;;  %v2941_v57 = vld [vmem:[#allocation3 + $0x44] sm:$0xf0] }
  0x1a   :  { %v2700_v56 = vor.u32 %v2959_v54, %v2699_v53  ;;  %v2691_v58 = vld [vmem:[#allocation3 + $0xc0] sm:$0xf]  ;;  %v2957_v59 = vld [vmem:[#allocation3 + $0xc4] sm:$0xf0]  ;;  %v2628_v60 = vor.u32 %v2941_v57, %v2627_v55  ;;  %v2619_v62 = vld [vmem:[#allocation3 + $0x30] sm:$0xf] }
  0x1b   :  { %1006 = vmatpush.bf16.msrb.mxu0 %v2648_v18  ;;  %1110 = vmatpush.bf16.msrb.mxu1 %v2712_v20  ;;  %v2692_v61 = vor.u32 %v2957_v59, %v2691_v58  ;;  %v2939_v63 = vld [vmem:[#allocation3 + $0x34] sm:$0xf0]  ;;  %v2683_v0 = vld [vmem:[#allocation3 + $0xb0] sm:$0xf]  ;;  %v2611_v5 = vld [vmem:[#allocation3 + $0x20] sm:$0xf] }
  0x1c   :  { %798 = vmatpush.bf16.msra.mxu2 %v2644_v41  ;;  %902 = vmatpush.bf16.msra.mxu3 %v2708_v43  ;;  %v2620_v1 = vor.u32 %v2939_v63, %v2619_v62  ;;  %v2955_v2 = vld [vmem:[#allocation3 + $0xb4] sm:$0xf0]  ;;  %v2919_v3 = vld [vmem:[%s4090_s0 + $0x30] sm:$0xff]  ;;  %v2937_v6 = vld [vmem:[#allocation3 + $0x24] sm:$0xf0] }
  0x1d   :  { %v2684_v4 = vor.u32 %v2955_v2, %v2683_v0  ;;  %v2612_v7 = vor.u32 %v2937_v6, %v2611_v5  ;;  %v2675_v8 = vld [vmem:[#allocation3 + $0xa0] sm:$0xf]  ;;  %v2953_v9 = vld [vmem:[#allocation3 + $0xa4] sm:$0xf0]  ;;  %v2603_v11 = vld [vmem:[#allocation3 + $0x10] sm:$0xf] }
  0x1e   :  { %v2676_v10 = vor.u32 %v2953_v9, %v2675_v8  ;;  %v2935_v12 = vld [vmem:[#allocation3 + $0x14] sm:$0xf0]  ;;  %v2667_v13 = vld [vmem:[#allocation3 + $0x90] sm:$0xf]  ;;  %v2595_v17 = vld [vmem:[#allocation3] sm:$0xf] }
  0x1f   :  { %1007 = vmatpush.bf16.msrb.mxu0 %v2640_v26  ;;  %1111 = vmatpush.bf16.msrb.mxu1 %v2704_v28  ;;  %v2604_v14 = vor.u32 %v2935_v12, %v2603_v11  ;;  %v2951_v15 = vld [vmem:[#allocation3 + $0x94] sm:$0xf0]  ;;  %v2933_v18 = vld [vmem:[#allocation3 + $0x4] sm:$0xf0]  ;;  %v2659_v19 = vld [vmem:[#allocation3 + $0x80] sm:$0xf] }
  0x20   :  { %799 = vmatpush.bf16.msra.mxu2 %v2636_v52  ;;  %903 = vmatpush.bf16.msra.mxu3 %v2700_v56  ;;  %v2668_v16 = vor.u32 %v2951_v15, %v2667_v13  ;;  %v2596_v20 = vor.u32 %v2933_v18, %v2595_v17  ;;  %v2920_v23 = vld [vmem:[%s4090_s0 + $0x38] sm:$0xff]  ;;  %v2779_v24 = vld [vmem:[#allocation5 + $0x70] sm:$0xf]  ;;  %v2921_v36 = vld [vmem:[%s4090_s0 + $0x40] sm:$0xff] }
  0x21   :  { %v2979_v25 = vld [vmem:[#allocation5 + $0x74] sm:$0xf0]  ;;  %v2843_v26 = vld [vmem:[#allocation5 + $0xf0] sm:$0xf]  ;;  %v2621_v31 = vld [vmem:[#allocation3 + $0x38] sm:$0xf0] }
  0x22   :  { %v2780_v27 = vor.u32 %v2979_v25, %v2779_v24  ;;  %v2995_v28 = vld [vmem:[#allocation5 + $0xf4] sm:$0xf0]  ;;  %v2954_v32 = vld [vmem:[#allocation3 + $0xb4] sm:$0xf]  ;;  %v2685_v34 = vld [vmem:[#allocation3 + $0xb8] sm:$0xf0] }
  0x23   :  { %1008 = vmatpush.bf16.msrb.mxu0 %v2632_v47  ;;  %1112 = vmatpush.bf16.msrb.mxu1 %v2696_v51  ;;  %v2688_v35 = vor.u32 %v2954_v32, %v2685_v34  ;;  %v2922_v54 = vld [vmem:[%s4090_s0 + $0x48] sm:$0xff]  ;;  %v2771_v57 = vld [vmem:[#allocation5 + $0x60] sm:$0xf]  ;;  %v2923_v11 = vld [vmem:[%s4090_s0 + $0x50] sm:$0xff] }
  0x24   :  { %800 = vmatpush.bf16.msra.mxu2 %v2628_v60  ;;  %904 = vmatpush.bf16.msra.mxu3 %v2692_v61  ;;  %v2977_v58 = vld [vmem:[#allocation5 + $0x64] sm:$0xf0]  ;;  %v2835_v60 = vld [vmem:[#allocation5 + $0xe0] sm:$0xf]  ;;  %v2613_v15 = vld [vmem:[#allocation3 + $0x28] sm:$0xf0] }
  0x25   :  { %v2772_v59 = vor.u32 %v2977_v58, %v2771_v57  ;;  %v2993_v61 = vld [vmem:[#allocation5 + $0xe4] sm:$0xf0]  ;;  %v2952_v17 = vld [vmem:[#allocation3 + $0xa4] sm:$0xf]  ;;  %v2677_v18 = vld [vmem:[#allocation3 + $0xa8] sm:$0xf0] }
  0x26   :  { %2556 = vmatmul.msk.bf16.gmra.mxu0 %vm212_vm1, %v2914_v21  ;;  %2575 = vmatmul.msk.bf16.gmra.mxu1 %vm212_vm1, %v2914_v21  ;;  %v2949_v21 = vld [vmem:[#allocation3 + $0x84] sm:$0xf0]  ;;  %v2836_v62 = vor.u32 %v2993_v61, %v2835_v60  ;;  %v2924_v32 = vld [vmem:[%s4090_s0 + $0x58] sm:$0xff]  ;;  %v2925_v57 = vld [vmem:[%s4090_s0 + $0x60] sm:$0xff] }
  0x27   :  { %1113 = vmatpush.bf16.msrb.mxu1 %v2688_v35  ;;  %v2934_v60 = vld [vmem:[#allocation3 + $0x14] sm:$0xf]  ;;  %v2605_v61 = vld [vmem:[#allocation3 + $0x18] sm:$0xf0] }
  0x28   :  { %801 = vmatpush.bf16.msra.mxu2 %v2620_v1  ;;  %905 = vmatpush.bf16.msra.mxu3 %v2684_v4 }
  0x2c   :  { %802 = vmatpush.bf16.msra.mxu2 %v2612_v7  ;;  %906 = vmatpush.bf16.msra.mxu3 %v2676_v10 }
  0x30   :  { %803 = vmatpush.bf16.msra.mxu2 %v2604_v14  ;;  %907 = vmatpush.bf16.msra.mxu3 %v2668_v16  ;;  %v2936_v14 = vld [vmem:[#allocation3 + $0x24] sm:$0xf] }
  0x31   :  { %v2616_v16 = vor.u32 %v2936_v14, %v2613_v15 }
  0x34   :  { %804 = vmatpush.bf16.msra.mxu2 %v2596_v20 }
  0x36   :  { %2557 = vmatmul.msk.bf16.gmra.mxu0 %vm212_vm1, %v2915_v22  ;;  %2576 = vmatmul.msk.bf16.gmra.mxu1 %vm212_vm1, %v2915_v22  ;;  %v2660_v22 = vor.u32 %v2949_v21, %v2659_v19  ;;  %v2680_v19 = vor.u32 %v2952_v17, %v2677_v18 }
  0x38   :  { %908 = vmatpush.bf16.msra.mxu3 %v2660_v22  ;;  %1525 = vmatpush.bf16.msrb.mxu2 %v2780_v27 }
  0x39   :  { %1114 = vmatpush.bf16.msrb.mxu1 %v2680_v19 }
  0x3c   :  { %1526 = vmatpush.bf16.msrb.mxu2 %v2772_v59 }
  0x46   :  { %2558 = vmatmul.msk.bf16.gmra.mxu0 %vm212_vm1, %v2916_v29  ;;  %2577 = vmatmul.msk.bf16.gmra.mxu1 %vm212_vm1, %v2916_v29  ;;  %v2844_v29 = vor.u32 %v2995_v28, %v2843_v26 }
  0x48   :  { %1629 = vmatpush.bf16.msrb.mxu3 %v2844_v29 }
  0x4c   :  { %1630 = vmatpush.bf16.msrb.mxu3 %v2836_v62  ;;  %v2608_v62 = vor.u32 %v2934_v60, %v2605_v61 }
  0x56   :  { %2559 = vmatmul.msk.bf16.gmra.mxu0 %vm212_vm1, %v2917_v30  ;;  %2578 = vmatmul.msk.bf16.gmra.mxu1 %vm212_vm1, %v2917_v30  ;;  %v2938_v30 = vld [vmem:[#allocation3 + $0x34] sm:$0xf] }
  0x57   :  { %v2624_v33 = vor.u32 %v2938_v30, %v2621_v31 }
  0x59   :  { %1009 = vmatpush.bf16.msrb.mxu0 %v2624_v33 }
  0x5d   :  { %1010 = vmatpush.bf16.msrb.mxu0 %v2616_v16  ;;  %v2926_v16 = vld [vmem:[%s4090_s0 + $0x68] sm:$0xff] }
  0x61   :  { %1011 = vmatpush.bf16.msrb.mxu0 %v2608_v62 }
  0x66   :  { %2560 = vmatmul.msk.bf16.gmra.mxu0 %vm212_vm1, %v2918_v37  ;;  %2579 = vmatmul.msk.bf16.gmra.mxu1 %vm212_vm1, %v2918_v37  ;;  %v106_v37 = vld [vmem:[%s4092_s2] sm:$0x3] }
  0x67   :  { %v3181_v40 = vperm.slane %v106_v37, 0  ;;  %v3183_v41 = vperm.slane %v106_v37, 1 }
  0x76   :  { %2561 = vmatmul.msk.bf16.gmra.mxu0 %vm212_vm1, %v2919_v3  ;;  %2580 = vmatmul.msk.bf16.gmra.mxu1 %vm212_vm1, %v2919_v3 }
  0x86   :  { %2562 = vmatmul.msk.bf16.gmra.mxu0 %vm212_vm1, %v2920_v23  ;;  %2581 = vmatmul.msk.bf16.gmra.mxu1 %vm212_vm1, %v2920_v23 }
  0x93   :  { %v286_v38 = vpop.f32.mrf.mxu0  ;;  %v390_v39 = vpop.f32.mrf.mxu1 }
  0x94   :  { %v287_v42 = vadd.f32 %v286_v38, %v3181_v40  ;;  %v391_v43 = vadd.f32 %v390_v39, %v3183_v41 }
  0x96   :  { %2563 = vmatmul.msk.bf16.gmra.mxu0 %vm212_vm1, %v2921_v36  ;;  %2582 = vmatmul.msk.bf16.gmra.mxu1 %vm212_vm1, %v2921_v36  ;;  %v485_v48 = vmax.f32 %v287_v42, 0.0  ;;  %v486_v49 = vmax.f32 %v391_v43, 0.0 }
  0x9b   :  { %v288_v44 = vpop.f32.mrf.mxu0  ;;  %v392_v45 = vpop.f32.mrf.mxu1 }
  0x9c   :  { %v289_v46 = vadd.f32 %v288_v44, %v3181_v40  ;;  %v393_v47 = vadd.f32 %v392_v45, %v3183_v41 }
  0x9e   :  { %v487_v50 = vmax.f32 %v289_v46, 0.0  ;;  %v488_v51 = vmax.f32 %v393_v47, 0.0  ;;  %v2763_v47 = vld [vmem:[#allocation5 + $0x50] sm:$0xf] }
  0xa0   :  { %v3191_v52 = vpack.c.bf16 %v487_v50, %v485_v48  ;;  %v3193_v53 = vpack.c.bf16 %v488_v51, %v486_v49  ;;  %v2975_v48 = vld [vmem:[#allocation5 + $0x54] sm:$0xf0]  ;;  %v2827_v50 = vld [vmem:[#allocation5 + $0xd0] sm:$0xf] }
  0xa1   :  { %v2764_v49 = vor.u32 %v2975_v48, %v2763_v47  ;;  %v2991_v51 = vld [vmem:[#allocation5 + $0xd4] sm:$0xf0] }
  0xa2   :  { %805 = vmatmul.bf16.vlgmr.msra.gmra.mxu2 %v3191_v52  ;;  %909 = vmatmul.bf16.vlgmr.msra.gmra.mxu3 %v3193_v53 }
  0xa3   :  { %v291_v55 = vpop.f32.mrf.mxu0  ;;  %v395_v56 = vpop.f32.mrf.mxu1  ;;  %1527 = vmatpush.bf16.msrb.mxu2 %v2764_v49 }
  0xa4   :  { %v292_v63 = vadd.f32 %v291_v55, %v3181_v40  ;;  %v396_v0 = vadd.f32 %v395_v56, %v3183_v41  ;;  %v2828_v56 = vor.u32 %v2991_v51, %v2827_v50 }
  0xa6   :  { %2564 = vmatmul.msk.bf16.gmra.mxu0 %vm212_vm1, %v2922_v54  ;;  %2583 = vmatmul.msk.bf16.gmra.mxu1 %vm212_vm1, %v2922_v54  ;;  %v489_v5 = vmax.f32 %v292_v63, 0.0  ;;  %v490_v6 = vmax.f32 %v396_v0, 0.0 }
  0xa7   :  { %1631 = vmatpush.bf16.msrb.mxu3 %v2828_v56 }
  0xab   :  { %v293_v1 = vpop.f32.mrf.mxu0  ;;  %v397_v2 = vpop.f32.mrf.mxu1 }
  0xac   :  { %v294_v3 = vadd.f32 %v293_v1, %v3181_v40  ;;  %v398_v4 = vadd.f32 %v397_v2, %v3183_v41 }
  0xae   :  { %v491_v7 = vmax.f32 %v294_v3, 0.0  ;;  %v492_v8 = vmax.f32 %v398_v4, 0.0 }
  0xb0   :  { %v3206_v9 = vpack.c.bf16 %v491_v7, %v489_v5  ;;  %v3208_v10 = vpack.c.bf16 %v492_v8, %v490_v6 }
  0xb2   :  { %810 = vmatmul.bf16.gmra.mxu2 %v3206_v9  ;;  %914 = vmatmul.bf16.gmra.mxu3 %v3208_v10 }
  0xb3   :  { %v296_v12 = vpop.f32.mrf.mxu0  ;;  %v400_v13 = vpop.f32.mrf.mxu1 }
  0xb4   :  { %v297_v20 = vadd.f32 %v296_v12, %v3181_v40  ;;  %v401_v21 = vadd.f32 %v400_v13, %v3183_v41  ;;  %v2669_v12 = vld [vmem:[#allocation3 + $0x98] sm:$0xf0] }
  0xb6   :  { %2565 = vmatmul.msk.bf16.gmra.mxu0 %vm212_vm1, %v2923_v11  ;;  %2584 = vmatmul.msk.bf16.gmra.mxu1 %vm212_vm1, %v2923_v11  ;;  %v493_v26 = vmax.f32 %v297_v20, 0.0  ;;  %v494_v27 = vmax.f32 %v401_v21, 0.0  ;;  %v2950_v11 = vld [vmem:[#allocation3 + $0x94] sm:$0xf] }
  0xb7   :  { %v2672_v13 = vor.u32 %v2950_v11, %v2669_v12 }
  0xb9   :  { %1115 = vmatpush.bf16.msrb.mxu1 %v2672_v13 }
  0xbb   :  { %v298_v22 = vpop.f32.mrf.mxu0  ;;  %v402_v23 = vpop.f32.mrf.mxu1 }
  0xbc   :  { %v299_v24 = vadd.f32 %v298_v22, %v3181_v40  ;;  %v403_v25 = vadd.f32 %v402_v23, %v3183_v41 }
  0xbe   :  { %v495_v28 = vmax.f32 %v299_v24, 0.0  ;;  %v496_v29 = vmax.f32 %v403_v25, 0.0 }
  0xc0   :  { %v3221_v30 = vpack.c.bf16 %v495_v28, %v493_v26  ;;  %v3223_v31 = vpack.c.bf16 %v496_v29, %v494_v27 }
  0xc2   :  { %815 = vmatmul.bf16.gmra.mxu2 %v3221_v30  ;;  %919 = vmatmul.bf16.gmra.mxu3 %v3223_v31 }
  0xc3   :  { %v301_v33 = vpop.f32.mrf.mxu0  ;;  %v405_v34 = vpop.f32.mrf.mxu1 }
  0xc4   :  { %v302_v35 = vadd.f32 %v301_v33, %v3181_v40  ;;  %v406_v36 = vadd.f32 %v405_v34, %v3183_v41  ;;  %v2927_v33 = vld [vmem:[%s4090_s0 + $0x70] sm:$0xff] }
  0xc6   :  { %2566 = vmatmul.msk.bf16.gmra.mxu0 %vm212_vm1, %v2924_v32  ;;  %2585 = vmatmul.msk.bf16.gmra.mxu1 %vm212_vm1, %v2924_v32  ;;  %v497_v43 = vmax.f32 %v302_v35, 0.0  ;;  %v498_v44 = vmax.f32 %v406_v36, 0.0  ;;  %v2755_v36 = vld [vmem:[#allocation5 + $0x40] sm:$0xf] }
  0xcb   :  { %v303_v37 = vpop.f32.mrf.mxu0  ;;  %v407_v38 = vpop.f32.mrf.mxu1 }
  0xcc   :  { %v304_v39 = vadd.f32 %v303_v37, %v3181_v40  ;;  %v408_v42 = vadd.f32 %v407_v38, %v3183_v41  ;;  %v2973_v37 = vld [vmem:[#allocation5 + $0x44] sm:$0xf0] }
  0xcd   :  { %v2756_v38 = vor.u32 %v2973_v37, %v2755_v36 }
  0xce   :  { %v499_v45 = vmax.f32 %v304_v39, 0.0  ;;  %v500_v46 = vmax.f32 %v408_v42, 0.0  ;;  %v2819_v39 = vld [vmem:[#allocation5 + $0xc0] sm:$0xf]  ;;  %v2989_v42 = vld [vmem:[#allocation5 + $0xc4] sm:$0xf0] }
  0xcf   :  { %1528 = vmatpush.bf16.msrb.mxu2 %v2756_v38  ;;  %v2747_v38 = vld [vmem:[#allocation5 + $0x30] sm:$0xf] }
  0xd0   :  { %v3236_v54 = vpack.c.bf16 %v499_v45, %v497_v43  ;;  %v3238_v55 = vpack.c.bf16 %v500_v46, %v498_v44  ;;  %v2820_v43 = vor.u32 %v2989_v42, %v2819_v39  ;;  %v2971_v39 = vld [vmem:[#allocation5 + $0x34] sm:$0xf0]  ;;  %v3314_v42 = vld [vmem:[%s4094_s4] sm:$0x3] }
  0xd2   :  { %820 = vmatmul.bf16.gmra.mxu2 %v3236_v54  ;;  %924 = vmatmul.bf16.gmra.mxu3 %v3238_v55 }
  0xd3   :  { %v306_v58 = vpop.f32.mrf.mxu0  ;;  %v410_v59 = vpop.f32.mrf.mxu1  ;;  %1632 = vmatpush.bf16.msrb.mxu3 %v2820_v43  ;;  %v2748_v43 = vor.u32 %v2971_v39, %v2747_v38 }
  0xd4   :  { %v307_v63 = vadd.f32 %v306_v58, %v3181_v40  ;;  %v411_v0 = vadd.f32 %v410_v59, %v3183_v41  ;;  %v2932_v58 = vld [vmem:[#allocation3 + $0x4] sm:$0xf]  ;;  %v2597_v59 = vld [vmem:[#allocation3 + $0x8] sm:$0xf0] }
  0xd5   :  { %v2600_v60 = vor.u32 %v2932_v58, %v2597_v59  ;;  %1529 = vmatpush.bf16.msrb.mxu2 %v2748_v43 }
  0xd6   :  { %2567 = vmatmul.msk.bf16.gmra.mxu0 %vm212_vm1, %v2925_v57  ;;  %2586 = vmatmul.msk.bf16.gmra.mxu1 %vm212_vm1, %v2925_v57  ;;  %v501_v5 = vmax.f32 %v307_v63, 0.0  ;;  %v502_v6 = vmax.f32 %v411_v0, 0.0  ;;  %v2928_v63 = vld [vmem:[%s4090_s0 + $0x78] sm:$0xff]  ;;  %v2948_v0 = vld [vmem:[#allocation3 + $0x84] sm:$0xf] }
  0xd7   :  { %1012 = vmatpush.bf16.msrb.mxu0 %v2600_v60 }
  0xdb   :  { %v308_v1 = vpop.f32.mrf.mxu0  ;;  %v412_v2 = vpop.f32.mrf.mxu1 }
  0xdc   :  { %v309_v3 = vadd.f32 %v308_v1, %v3181_v40  ;;  %v413_v4 = vadd.f32 %v412_v2, %v3183_v41  ;;  %v2661_v1 = vld [vmem:[#allocation3 + $0x88] sm:$0xf0] }
  0xde   :  { %v503_v7 = vmax.f32 %v309_v3, 0.0  ;;  %v504_v8 = vmax.f32 %v413_v4, 0.0  ;;  %v2664_v4 = vor.u32 %v2948_v0, %v2661_v1  ;;  %v2978_v1 = vld [vmem:[#allocation5 + $0x74] sm:$0xf] }
  0xe0   :  { %v3251_v14 = vpack.c.bf16 %v503_v7, %v501_v5  ;;  %v3253_v15 = vpack.c.bf16 %v504_v8, %v502_v6  ;;  %1116 = vmatpush.bf16.msrb.mxu1 %v2664_v4 }
  0xe2   :  { %825 = vmatmul.bf16.gmra.mxu2 %v3251_v14  ;;  %929 = vmatmul.bf16.gmra.mxu3 %v3253_v15 }
  0xe3   :  { %v311_v17 = vpop.f32.mrf.mxu0  ;;  %v415_v18 = vpop.f32.mrf.mxu1 }
  0xe4   :  { %v312_v19 = vadd.f32 %v311_v17, %v3181_v40  ;;  %v416_v20 = vadd.f32 %v415_v18, %v3183_v41 }
  0xe6   :  { %2568 = vmatmul.msk.bf16.gmra.mxu0 %vm212_vm1, %v2926_v16  ;;  %2587 = vmatmul.msk.bf16.gmra.mxu1 %vm212_vm1, %v2926_v16  ;;  %v505_v25 = vmax.f32 %v312_v19, 0.0  ;;  %v506_v26 = vmax.f32 %v416_v20, 0.0 }
  0xeb   :  { %v313_v21 = vpop.f32.mrf.mxu0  ;;  %v417_v22 = vpop.f32.mrf.mxu1 }
  0xec   :  { %v314_v23 = vadd.f32 %v313_v21, %v3181_v40  ;;  %v418_v24 = vadd.f32 %v417_v22, %v3183_v41  ;;  %v2929_v21 = vld [vmem:[%s4090_s0 + $0x80] sm:$0xff] }
  0xee   :  { %v507_v27 = vmax.f32 %v314_v23, 0.0  ;;  %v508_v28 = vmax.f32 %v418_v24, 0.0 }
  0xf0   :  { %v3266_v29 = vpack.c.bf16 %v507_v27, %v505_v25  ;;  %v3268_v32 = vpack.c.bf16 %v508_v28, %v506_v26 }
  0xf2   :  { %830 = vmatmul.bf16.gmra.mxu2 %v3266_v29  ;;  %934 = vmatmul.bf16.gmra.mxu3 %v3268_v32 }
  0xf3   :  { %v316_v34 = vpop.f32.mrf.mxu0  ;;  %v420_v35 = vpop.f32.mrf.mxu1 }
  0xf4   :  { %v317_v44 = vadd.f32 %v316_v34, %v3181_v40  ;;  %v421_v45 = vadd.f32 %v420_v35, %v3183_v41 }
  0xf6   :  { %2569 = vmatmul.msk.bf16.gmra.mxu0 %vm212_vm1, %v2927_v33  ;;  %2588 = vmatmul.msk.bf16.gmra.mxu1 %vm212_vm1, %v2927_v33  ;;  %v509_v50 = vmax.f32 %v317_v44, 0.0  ;;  %v510_v51 = vmax.f32 %v421_v45, 0.0  ;;  %v2811_v44 = vld [vmem:[#allocation5 + $0xb0] sm:$0xf]  ;;  %v2987_v45 = vld [vmem:[#allocation5 + $0xb4] sm:$0xf0] }
  0xfb   :  { %v318_v46 = vpop.f32.mrf.mxu0  ;;  %v422_v47 = vpop.f32.mrf.mxu1 }
  0xfc   :  { %v319_v48 = vadd.f32 %v318_v46, %v3181_v40  ;;  %v423_v49 = vadd.f32 %v422_v47, %v3183_v41 }
  0xfe   :  { %v511_v56 = vmax.f32 %v319_v48, 0.0  ;;  %v512_v57 = vmax.f32 %v423_v49, 0.0  ;;  %v2812_v48 = vor.u32 %v2987_v45, %v2811_v44  ;;  %v3323_v49 = vperm.slane %v3314_v42, 0 }
 0x100   :  { %v3281_v61 = vpack.c.bf16 %v511_v56, %v509_v50  ;;  %v3283_v62 = vpack.c.bf16 %v512_v57, %v510_v51  ;;  %v2930_v50 = vld [vmem:[%s4090_s0 + $0x88] sm:$0xff]  ;;  %1633 = vmatpush.bf16.msrb.mxu3 %v2812_v48 }
 0x102   :  { %835 = vmatmul.bf16.gmra.mxu2 %v3281_v61  ;;  %939 = vmatmul.bf16.gmra.mxu3 %v3283_v62 }
 0x103   :  { %v321_v2 = vpop.f32.mrf.mxu0  ;;  %v425_v3 = vpop.f32.mrf.mxu1 }
 0x104   :  { %v322_v5 = vadd.f32 %v321_v2, %v3181_v40  ;;  %v426_v6 = vadd.f32 %v425_v3, %v3183_v41  ;;  %v2781_v2 = vld [vmem:[#allocation5 + $0x78] sm:$0xf0] }
 0x106   :  { %2570 = vmatmul.msk.bf16.gmra.mxu0 %vm212_vm1, %v2928_v63  ;;  %2589 = vmatmul.msk.bf16.gmra.mxu1 %vm212_vm1, %v2928_v63  ;;  %v513_v13 = vmax.f32 %v322_v5, 0.0  ;;  %v514_v16 = vmax.f32 %v426_v6, 0.0  ;;  %v2784_v5 = vor.u32 %v2978_v1, %v2781_v2  ;;  %v2994_v6 = vld [vmem:[#allocation5 + $0xf4] sm:$0xf] }
 0x108   :  { %1733 = vmatpush.bf16.msra.mxu0 %v2784_v5 }
 0x10b   :  { %v323_v7 = vpop.f32.mrf.mxu0  ;;  %v427_v8 = vpop.f32.mrf.mxu1 }
 0x10c   :  { %v324_v11 = vadd.f32 %v323_v7, %v3181_v40  ;;  %v428_v12 = vadd.f32 %v427_v8, %v3183_v41  ;;  %v2845_v7 = vld [vmem:[#allocation5 + $0xf8] sm:$0xf0] }
 0x10e   :  { %v515_v17 = vmax.f32 %v324_v11, 0.0  ;;  %v516_v18 = vmax.f32 %v428_v12, 0.0  ;;  %v2848_v12 = vor.u32 %v2994_v6, %v2845_v7 }
 0x110   :  { %v3296_v19 = vpack.c.bf16 %v515_v17, %v513_v13  ;;  %v3298_v20 = vpack.c.bf16 %v516_v18, %v514_v16  ;;  %1837 = vmatpush.bf16.msra.mxu1 %v2848_v12  ;;  %v2969_v12 = vld [vmem:[#allocation5 + $0x24] sm:$0xf0] }
 0x112   :  { %840 = vmatmul.bf16.gmra.mxu2 %v3296_v19  ;;  %944 = vmatmul.bf16.gmra.mxu3 %v3298_v20 }
 0x113   :  { %v326_v22 = vpop.f32.mrf.mxu0  ;;  %v430_v23 = vpop.f32.mrf.mxu1 }
 0x114   :  { %v327_v24 = vadd.f32 %v326_v22, %v3181_v40  ;;  %v431_v25 = vadd.f32 %v430_v23, %v3183_v41 }
 0x116   :  { %2571 = vmatmul.msk.bf16.gmra.mxu0 %vm212_vm1, %v2929_v21  ;;  %2590 = vmatmul.msk.bf16.gmra.mxu1 %vm212_vm1, %v2929_v21  ;;  %v517_v34 = vmax.f32 %v327_v24, 0.0  ;;  %v518_v35 = vmax.f32 %v431_v25, 0.0  ;;  %v2553_v24 = vld [vmem:[%s4090_s0 + $0x90] sm:$0xf]  ;;  %v2931_v25 = vld [vmem:[%s4090_s0 + $0x90] sm:$0x30] }
 0x11b   :  { %v328_v26 = vpop.f32.mrf.mxu0  ;;  %v432_v27 = vpop.f32.mrf.mxu1 }
 0x11c   :  { %v329_v28 = vadd.f32 %v328_v26, %v3181_v40  ;;  %v433_v33 = vadd.f32 %v432_v27, %v3183_v41 }
 0x11e   :  { %v519_v36 = vmax.f32 %v329_v28, 0.0  ;;  %v520_v37 = vmax.f32 %v433_v33, 0.0 }
 0x120   :  { %v3316_v46 = vpack.c.bf16 %v519_v36, %v517_v34  ;;  %v3318_v47 = vpack.c.bf16 %v520_v37, %v518_v35  ;;  %v2554_v35 = vor.u32 %v2931_v25, %v2553_v24 }
 0x122   :  { %845 = vmatmul.bf16.gmra.mxu2 %v3316_v46  ;;  %949 = vmatmul.bf16.gmra.mxu3 %v3318_v47 }
 0x123   :  { %v331_v51 = vpop.f32.mrf.mxu0  ;;  %v435_v56 = vpop.f32.mrf.mxu1 }
 0x124   :  { %v332_v63 = vadd.f32 %v331_v51, %v3181_v40  ;;  %v436_v0 = vadd.f32 %v435_v56, %v3183_v41 }
 0x125   :  { %v806_v57 = vpop.f32.mrf.mxu2  ;;  %v910_v58 = vpop.f32.mrf.mxu3 }
 0x126   :  { %v807_v59 = vadd.f32 %v806_v57, %v3323_v49  ;;  %2572 = vmatmul.msk.bf16.gmra.mxu0 %vm212_vm1, %v2930_v50  ;;  %2591 = vmatmul.msk.bf16.gmra.mxu1 %vm212_vm1, %v2930_v50  ;;  %v521_v13 = vmax.f32 %v332_v63, 0.0  ;;  %v522_v18 = vmax.f32 %v436_v0, 0.0 }
 0x128   :  { %v911_v60 = vadd.f32 %v910_v58, %v807_v59 }
 0x12a   :  { %v1213_v33 = vmax.f32 %v911_v60, 0.0 }
 0x12b   :  { %v333_v3 = vpop.f32.mrf.mxu0  ;;  %v437_v4 = vpop.f32.mrf.mxu1 }
 0x12c   :  { %v334_v8 = vadd.f32 %v333_v3, %v3181_v40  ;;  %v438_v11 = vadd.f32 %v437_v4, %v3183_v41 }
 0x12d   :  { %v808_v16 = vpop.f32.mrf.mxu2  ;;  %v912_v17 = vpop.f32.mrf.mxu3 }
 0x12e   :  { %v523_v21 = vmax.f32 %v334_v8, 0.0  ;;  %v524_v22 = vmax.f32 %v438_v11, 0.0  ;;  %v809_v23 = vadd.f32 %v808_v16, %v3323_v49  ;;  %v2739_v11 = vld [vmem:[#allocation5 + $0x20] sm:$0xf] }
 0x130   :  { %v913_v26 = vadd.f32 %v912_v17, %v809_v23  ;;  %v3342_v27 = vpack.c.bf16 %v523_v21, %v521_v13  ;;  %v3344_v28 = vpack.c.bf16 %v524_v22, %v522_v18  ;;  %v2740_v17 = vor.u32 %v2969_v12, %v2739_v11  ;;  %v2803_v18 = vld [vmem:[#allocation5 + $0xa0] sm:$0xf]  ;;  %v2985_v21 = vld [vmem:[#allocation5 + $0xa4] sm:$0xf0] }
 0x131   :  { %v2804_v22 = vor.u32 %v2985_v21, %v2803_v18 }
 0x132   :  { %v1215_v34 = vmax.f32 %v913_v26, 0.0  ;;  %850 = vmatmul.bf16.gmra.mxu2 %v3342_v27  ;;  %954 = vmatmul.bf16.gmra.mxu3 %v3344_v28 }
 0x133   :  { %v336_v36 = vpop.f32.mrf.mxu0  ;;  %v440_v37 = vpop.f32.mrf.mxu1  ;;  %1530 = vmatpush.bf16.msrb.mxu2 %v2740_v17  ;;  %1634 = vmatpush.bf16.msrb.mxu3 %v2804_v22 }
 0x134   :  { %v3348_v38 = vpack.c.bf16 %v1215_v34, %v1213_v33  ;;  %v337_v48 = vadd.f32 %v336_v36, %v3181_v40  ;;  %v441_v50 = vadd.f32 %v440_v37, %v3183_v41 }
 0x135   :  { %v811_v39 = vpop.f32.mrf.mxu2  ;;  %v915_v43 = vpop.f32.mrf.mxu3 }
 0x136   :  { %v812_v44 = vadd.f32 %v811_v39, %v3323_v49  ;;  %2573 = vmatmul.msk.bf16.gmra.mxu0 %vm212_vm1, %v2554_v35  ;;  %2592 = vmatmul.msk.bf16.gmra.mxu1 %vm212_vm1, %v2554_v35  ;;  %v525_v59 = vmax.f32 %v337_v48, 0.0  ;;  %v526_v0 = vmax.f32 %v441_v50, 0.0 }
 0x138   :  { %v916_v45 = vadd.f32 %v915_v43, %v812_v44 }
 0x13a   :  { %v1217_v7 = vmax.f32 %v916_v45, 0.0 }
 0x13b   :  { %v338_v51 = vpop.f32.mrf.mxu0  ;;  %v442_v56 = vpop.f32.mrf.mxu1 }
 0x13c   :  { %v339_v57 = vadd.f32 %v338_v51, %v3181_v40  ;;  %v443_v58 = vadd.f32 %v442_v56, %v3183_v41  ;;  %v2976_v56 = vld [vmem:[#allocation5 + $0x64] sm:$0xf] }
 0x13d   :  { %v813_v60 = vpop.f32.mrf.mxu2  ;;  %v917_v63 = vpop.f32.mrf.mxu3 }
 0x13e   :  { %v527_v1 = vmax.f32 %v339_v57, 0.0  ;;  %v528_v2 = vmax.f32 %v443_v58, 0.0  ;;  %v814_v3 = vadd.f32 %v813_v60, %v3323_v49  ;;  %v2773_v57 = vld [vmem:[#allocation5 + $0x68] sm:$0xf0] }
 0x13f   :  { %v2776_v58 = vor.u32 %v2976_v56, %v2773_v57 }
 0x140   :  { %v918_v4 = vadd.f32 %v917_v63, %v814_v3  ;;  %v3358_v5 = vpack.c.bf16 %v527_v1, %v525_v59  ;;  %v3360_v6 = vpack.c.bf16 %v528_v2, %v526_v0  ;;  %v2992_v2 = vld [vmem:[#allocation5 + $0xe4] sm:$0xf]  ;;  %v2837_v3 = vld [vmem:[#allocation5 + $0xe8] sm:$0xf0] }
 0x141   :  { %1734 = vmatpush.bf16.msra.mxu0 %v2776_v58 }
 0x142   :  { %v1219_v8 = vmax.f32 %v918_v4, 0.0  ;;  %855 = vmatmul.bf16.gmra.mxu2 %v3358_v5  ;;  %959 = vmatmul.bf16.gmra.mxu3 %v3360_v6 }
 0x143   :  { %v341_v13 = vpop.f32.mrf.mxu0  ;;  %v445_v16 = vpop.f32.mrf.mxu1 }
 0x144   :  { %v3364_v23 = vpack.c.bf16 %v1219_v8, %v1217_v7  ;;  %v342_v34 = vadd.f32 %v341_v13, %v3181_v40  ;;  %v446_v35 = vadd.f32 %v445_v16, %v3183_v41  ;;  %v2840_v8 = vor.u32 %v2992_v2, %v2837_v3  ;;  %v2967_v2 = vld [vmem:[#allocation5 + $0x14] sm:$0xf0] }
 0x145   :  { %v816_v24 = vpop.f32.mrf.mxu2  ;;  %v920_v25 = vpop.f32.mrf.mxu3 }
 0x146   :  { %v817_v26 = vadd.f32 %v816_v24, %v3323_v49  ;;  %1013 = vmatmul.bf16.vlgmr.msrb.gmra.mxu0 %v3191_v52  ;;  %1117 = vmatmul.bf16.vlgmr.msrb.gmra.mxu1 %v3193_v53  ;;  %v529_v44 = vmax.f32 %v342_v34, 0.0  ;;  %v530_v45 = vmax.f32 %v446_v35, 0.0 }
 0x147   :  { %1838 = vmatpush.bf16.msra.mxu1 %v2840_v8  ;;  %v2795_v8 = vld [vmem:[#allocation5 + $0x90] sm:$0xf] }
 0x148   :  { %v921_v33 = vadd.f32 %v920_v25, %v817_v26 }
 0x14a   :  { %v1221_v0 = vmax.f32 %v921_v33, 0.0 }
 0x14b   :  { %v343_v36 = vpop.f32.mrf.mxu0  ;;  %v447_v37 = vpop.f32.mrf.mxu1 }
 0x14c   :  { %v344_v39 = vadd.f32 %v343_v36, %v3181_v40  ;;  %v448_v43 = vadd.f32 %v447_v37, %v3183_v41 }
 0x14d   :  { %v818_v48 = vpop.f32.mrf.mxu2  ;;  %v922_v50 = vpop.f32.mrf.mxu3 }
 0x14e   :  { %v531_v51 = vmax.f32 %v344_v39, 0.0  ;;  %v532_v52 = vmax.f32 %v448_v43, 0.0  ;;  %v819_v53 = vadd.f32 %v818_v48, %v3323_v49 }
 0x150   :  { %v923_v59 = vadd.f32 %v922_v50, %v819_v53  ;;  %v3374_v60 = vpack.c.bf16 %v531_v51, %v529_v44  ;;  %v3376_v63 = vpack.c.bf16 %v532_v52, %v530_v45 }
 0x152   :  { %v1223_v1 = vmax.f32 %v923_v59, 0.0  ;;  %860 = vmatmul.bf16.gmra.mxu2 %v3374_v60  ;;  %964 = vmatmul.bf16.gmra.mxu3 %v3376_v63 }
 0x153   :  { %v346_v4 = vpop.f32.mrf.mxu0  ;;  %v450_v7 = vpop.f32.mrf.mxu1 }
 0x154   :  { %v3380_v11 = vpack.c.bf16 %v1223_v1, %v1221_v0  ;;  %v347_v18 = vadd.f32 %v346_v4, %v3181_v40  ;;  %v451_v21 = vadd.f32 %v450_v7, %v3183_v41  ;;  %v2731_v1 = vld [vmem:[#allocation5 + $0x10] sm:$0xf] }
 0x155   :  { %v821_v12 = vpop.f32.mrf.mxu2  ;;  %v925_v13 = vpop.f32.mrf.mxu3  ;;  %v2732_v7 = vor.u32 %v2967_v2, %v2731_v1 }
 0x156   :  { %v822_v16 = vadd.f32 %v821_v12, %v3323_v49  ;;  %1018 = vmatmul.bf16.gmra.mxu0 %v3206_v9  ;;  %1122 = vmatmul.bf16.gmra.mxu1 %v3208_v10  ;;  %v533_v33 = vmax.f32 %v347_v18, 0.0  ;;  %v534_v36 = vmax.f32 %v451_v21, 0.0  ;;  %v2983_v12 = vld [vmem:[#allocation5 + $0x94] sm:$0xf0] }
 0x157   :  { %1531 = vmatpush.bf16.msrb.mxu2 %v2732_v7 }
 0x158   :  { %v926_v17 = vadd.f32 %v925_v13, %v822_v16 }
 0x15a   :  { %v1225_v45 = vmax.f32 %v926_v17, 0.0  ;;  %v2796_v17 = vor.u32 %v2983_v12, %v2795_v8 }
 0x15b   :  { %v348_v22 = vpop.f32.mrf.mxu0  ;;  %v452_v24 = vpop.f32.mrf.mxu1 }
 0x15c   :  { %v349_v25 = vadd.f32 %v348_v22, %v3181_v40  ;;  %v453_v26 = vadd.f32 %v452_v24, %v3183_v41  ;;  %1635 = vmatpush.bf16.msrb.mxu3 %v2796_v17 }
 0x15d   :  { %v823_v34 = vpop.f32.mrf.mxu2  ;;  %v927_v35 = vpop.f32.mrf.mxu3 }
 0x15e   :  { %v535_v37 = vmax.f32 %v349_v25, 0.0  ;;  %v536_v39 = vmax.f32 %v453_v26, 0.0  ;;  %v824_v9 = vadd.f32 %v823_v34, %v3323_v49 }
 0x160   :  { %v928_v10 = vadd.f32 %v927_v35, %v824_v9  ;;  %v3390_v43 = vpack.c.bf16 %v535_v37, %v533_v33  ;;  %v3392_v44 = vpack.c.bf16 %v536_v39, %v534_v36  ;;  %v2974_v37 = vld [vmem:[#allocation5 + $0x54] sm:$0xf]  ;;  %v2765_v39 = vld [vmem:[#allocation5 + $0x58] sm:$0xf0] }
 0x162   :  { %v1227_v48 = vmax.f32 %v928_v10, 0.0  ;;  %865 = vmatmul.bf16.gmra.mxu2 %v3390_v43  ;;  %969 = vmatmul.bf16.gmra.mxu3 %v3392_v44 }
 0x163   :  { %v351_v50 = vpop.f32.mrf.mxu0  ;;  %v455_v51 = vpop.f32.mrf.mxu1 }
 0x164   :  { %v3396_v52 = vpack.c.bf16 %v1227_v48, %v1225_v45  ;;  %v352_v59 = vadd.f32 %v351_v50, %v3181_v40  ;;  %v456_v0 = vadd.f32 %v455_v51, %v3183_v41  ;;  %v2768_v45 = vor.u32 %v2974_v37, %v2765_v39 }
 0x165   :  { %v826_v53 = vpop.f32.mrf.mxu2  ;;  %v930_v56 = vpop.f32.mrf.mxu3 }
 0x166   :  { %v827_v57 = vadd.f32 %v826_v53, %v3323_v49  ;;  %1023 = vmatmul.bf16.gmra.mxu0 %v3221_v30  ;;  %1127 = vmatmul.bf16.gmra.mxu1 %v3223_v31  ;;  %v537_v30 = vmax.f32 %v352_v59, 0.0  ;;  %v538_v21 = vmax.f32 %v456_v0, 0.0 }
 0x167   :  { %1735 = vmatpush.bf16.msra.mxu0 %v2768_v45 }
 0x168   :  { %v931_v58 = vadd.f32 %v930_v56, %v827_v57  ;;  %v2990_v56 = vld [vmem:[#allocation5 + $0xd4] sm:$0xf]  ;;  %v2829_v57 = vld [vmem:[#allocation5 + $0xd8] sm:$0xf0] }
 0x16a   :  { %v1229_v35 = vmax.f32 %v931_v58, 0.0  ;;  %v2832_v58 = vor.u32 %v2990_v56, %v2829_v57 }
 0x16b   :  { %v353_v3 = vpop.f32.mrf.mxu0  ;;  %v457_v4 = vpop.f32.mrf.mxu1 }
 0x16c   :  { %v354_v13 = vadd.f32 %v353_v3, %v3181_v40  ;;  %v458_v16 = vadd.f32 %v457_v4, %v3183_v41  ;;  %1839 = vmatpush.bf16.msra.mxu1 %v2832_v58 }
 0x16d   :  { %v828_v18 = vpop.f32.mrf.mxu2  ;;  %v932_v31 = vpop.f32.mrf.mxu3 }
 0x16e   :  { %v539_v22 = vmax.f32 %v354_v13, 0.0  ;;  %v540_v24 = vmax.f32 %v458_v16, 0.0  ;;  %v829_v25 = vadd.f32 %v828_v18, %v3323_v49 }
 0x170   :  { %v933_v26 = vadd.f32 %v932_v31, %v829_v25  ;;  %v3406_v33 = vpack.c.bf16 %v539_v22, %v537_v30  ;;  %v3408_v34 = vpack.c.bf16 %v540_v24, %v538_v21 }
 0x172   :  { %v1231_v36 = vmax.f32 %v933_v26, 0.0  ;;  %870 = vmatmul.bf16.gmra.mxu2 %v3406_v33  ;;  %974 = vmatmul.bf16.gmra.mxu3 %v3408_v34 }
 0x173   :  { %v356_v9 = vpop.f32.mrf.mxu0  ;;  %v460_v10 = vpop.f32.mrf.mxu1 }
 0x174   :  { %v3412_v48 = vpack.c.bf16 %v1231_v36, %v1229_v35  ;;  %v357_v0 = vadd.f32 %v356_v9, %v3181_v40  ;;  %v461_v1 = vadd.f32 %v460_v10, %v3183_v41 }
 0x175   :  { %v831_v50 = vpop.f32.mrf.mxu2  ;;  %v935_v51 = vpop.f32.mrf.mxu3 }
 0x176   :  { %v832_v53 = vadd.f32 %v831_v50, %v3323_v49  ;;  %1028 = vmatmul.bf16.gmra.mxu0 %v3236_v54  ;;  %1132 = vmatmul.bf16.gmra.mxu1 %v3238_v55  ;;  %v541_v8 = vmax.f32 %v357_v0, 0.0  ;;  %v542_v13 = vmax.f32 %v461_v1, 0.0 }
 0x178   :  { %v936_v59 = vadd.f32 %v935_v51, %v832_v53 }
 0x17a   :  { %v1233_v21 = vmax.f32 %v936_v59, 0.0 }
 0x17b   :  { %v358_v2 = vpop.f32.mrf.mxu0  ;;  %v462_v3 = vpop.f32.mrf.mxu1 }
 0x17c   :  { %v359_v4 = vadd.f32 %v358_v2, %v3181_v40  ;;  %v463_v7 = vadd.f32 %v462_v3, %v3183_v41 }
 0x17d   :  { %v833_v12 = vpop.f32.mrf.mxu2  ;;  %v937_v54 = vpop.f32.mrf.mxu3 }
 0x17e   :  { %v543_v55 = vmax.f32 %v359_v4, 0.0  ;;  %v544_v16 = vmax.f32 %v463_v7, 0.0  ;;  %v834_v17 = vadd.f32 %v833_v12, %v3323_v49  ;;  %v2965_v12 = vld [vmem:[#allocation5 + $0x4] sm:$0xf0] }
 0x180   :  { %v938_v30 = vadd.f32 %v937_v54, %v834_v17  ;;  %v3422_v18 = vpack.c.bf16 %v543_v55, %v541_v8  ;;  %v3424_v31 = vpack.c.bf16 %v544_v16, %v542_v13  ;;  %v2723_v8 = vld [vmem:[#allocation5] sm:$0xf]  ;;  %v2981_v17 = vld [vmem:[#allocation5 + $0x84] sm:$0xf0] }
 0x181   :  { %v2724_v55 = vor.u32 %v2965_v12, %v2723_v8  ;;  %v2787_v16 = vld [vmem:[#allocation5 + $0x80] sm:$0xf] }
 0x182   :  { %v1235_v22 = vmax.f32 %v938_v30, 0.0  ;;  %875 = vmatmul.bf16.gmra.mxu2 %v3422_v18  ;;  %979 = vmatmul.bf16.gmra.mxu3 %v3424_v31  ;;  %v2788_v30 = vor.u32 %v2981_v17, %v2787_v16 }
 0x183   :  { %v361_v24 = vpop.f32.mrf.mxu0  ;;  %v465_v25 = vpop.f32.mrf.mxu1  ;;  %1532 = vmatpush.bf16.msrb.mxu2 %v2724_v55 }
 0x184   :  { %v3428_v26 = vpack.c.bf16 %v1235_v22, %v1233_v21  ;;  %v362_v9 = vadd.f32 %v361_v24, %v3181_v40  ;;  %v466_v10 = vadd.f32 %v465_v25, %v3183_v41  ;;  %1636 = vmatpush.bf16.msrb.mxu3 %v2788_v30 }
 0x185   :  { %v836_v35 = vpop.f32.mrf.mxu2  ;;  %v940_v36 = vpop.f32.mrf.mxu3 }
 0x186   :  { %v837_v37 = vadd.f32 %v836_v35, %v3323_v49  ;;  %1033 = vmatmul.bf16.gmra.mxu0 %v3251_v14  ;;  %1137 = vmatmul.bf16.gmra.mxu1 %v3253_v15  ;;  %v545_v56 = vmax.f32 %v362_v9, 0.0  ;;  %v546_v59 = vmax.f32 %v466_v10, 0.0  ;;  %v2757_v9 = vld [vmem:[#allocation5 + $0x48] sm:$0xf0] }
 0x188   :  { %v941_v39 = vadd.f32 %v940_v36, %v837_v37 }
 0x18a   :  { %v1237_v4 = vmax.f32 %v941_v39, 0.0  ;;  %v2972_v39 = vld [vmem:[#allocation5 + $0x44] sm:$0xf] }
 0x18b   :  { %v363_v45 = vpop.f32.mrf.mxu0  ;;  %v467_v50 = vpop.f32.mrf.mxu1 }
 0x18c   :  { %v364_v51 = vadd.f32 %v363_v45, %v3181_v40  ;;  %v468_v53 = vadd.f32 %v467_v50, %v3183_v41  ;;  %v2760_v50 = vor.u32 %v2972_v39, %v2757_v9 }
 0x18d   :  { %v838_v57 = vpop.f32.mrf.mxu2  ;;  %v942_v58 = vpop.f32.mrf.mxu3 }
 0x18e   :  { %v547_v0 = vmax.f32 %v364_v51, 0.0  ;;  %v548_v1 = vmax.f32 %v468_v53, 0.0  ;;  %v839_v14 = vadd.f32 %v838_v57, %v3323_v49  ;;  %v2988_v51 = vld [vmem:[#allocation5 + $0xc4] sm:$0xf]  ;;  %v2821_v53 = vld [vmem:[#allocation5 + $0xc8] sm:$0xf0]  ;;  %1736 = vmatpush.bf16.msra.mxu0 %v2760_v50 }
 0x190   :  { %v943_v15 = vadd.f32 %v942_v58, %v839_v14  ;;  %v3438_v2 = vpack.c.bf16 %v547_v0, %v545_v56  ;;  %v3440_v3 = vpack.c.bf16 %v548_v1, %v546_v59 }
 0x192   :  { %v1239_v7 = vmax.f32 %v943_v15, 0.0  ;;  %880 = vmatmul.bf16.gmra.mxu2 %v3438_v2  ;;  %984 = vmatmul.bf16.gmra.mxu3 %v3440_v3 }
 0x193   :  { %v366_v54 = vpop.f32.mrf.mxu0  ;;  %v470_v13 = vpop.f32.mrf.mxu1 }
 0x194   :  { %v3444_v21 = vpack.c.bf16 %v1239_v7, %v1237_v4  ;;  %v367_v36 = vadd.f32 %v366_v54, %v3181_v40  ;;  %v471_v37 = vadd.f32 %v470_v13, %v3183_v41 }
 0x195   :  { %v841_v22 = vpop.f32.mrf.mxu2  ;;  %v945_v24 = vpop.f32.mrf.mxu3 }
 0x196   :  { %v842_v25 = vadd.f32 %v841_v22, %v3323_v49  ;;  %1038 = vmatmul.bf16.gmra.mxu0 %v3266_v29  ;;  %1142 = vmatmul.bf16.gmra.mxu1 %v3268_v32  ;;  %v2824_v29 = vor.u32 %v2988_v51, %v2821_v53  ;;  %v549_v58 = vmax.f32 %v367_v36, 0.0  ;;  %v550_v0 = vmax.f32 %v471_v37, 0.0 }
 0x198   :  { %v946_v35 = vadd.f32 %v945_v24, %v842_v25  ;;  %1840 = vmatpush.bf16.msra.mxu1 %v2824_v29 }
 0x19a   :  { %v1241_v12 = vmax.f32 %v946_v35, 0.0 }
 0x19b   :  { %v368_v10 = vpop.f32.mrf.mxu0  ;;  %v472_v45 = vpop.f32.mrf.mxu1 }
 0x19c   :  { %v369_v56 = vadd.f32 %v368_v10, %v3181_v40  ;;  %v473_v57 = vadd.f32 %v472_v45, %v3183_v41 }
 0x19d   :  { %v843_v32 = vpop.f32.mrf.mxu2  ;;  %v947_v59 = vpop.f32.mrf.mxu3 }
 0x19e   :  { %v551_v1 = vmax.f32 %v369_v56, 0.0  ;;  %v552_v14 = vmax.f32 %v473_v57, 0.0  ;;  %v844_v15 = vadd.f32 %v843_v32, %v3323_v49 }
 0x1a0   :  { %v948_v4 = vadd.f32 %v947_v59, %v844_v15  ;;  %v3454_v7 = vpack.c.bf16 %v551_v1, %v549_v58  ;;  %v3456_v8 = vpack.c.bf16 %v552_v14, %v550_v0 }
 0x1a2   :  { %v1243_v54 = vmax.f32 %v948_v4, 0.0  ;;  %885 = vmatmul.bf16.gmra.mxu2 %v3454_v7  ;;  %989 = vmatmul.bf16.gmra.mxu3 %v3456_v8 }
 0x1a3   :  { %v371_v13 = vpop.f32.mrf.mxu0  ;;  %v475_v55 = vpop.f32.mrf.mxu1 }
 0x1a4   :  { %v3460_v16 = vpack.c.bf16 %v1243_v54, %v1241_v12  ;;  %v372_v25 = vadd.f32 %v371_v13, %v3181_v40  ;;  %v476_v35 = vadd.f32 %v475_v55, %v3183_v41  ;;  %v3003_v54 = vld [vmem:[%s4097_s7 + $0x38] sm:$0xff] }
 0x1a5   :  { %v846_v17 = vpop.f32.mrf.mxu2  ;;  %v950_v30 = vpop.f32.mrf.mxu3  ;;  %v3011_v13 = vld [vmem:[%s4097_s7 + $0x78] sm:$0xff]  ;;  %2183 = vmatpush.bf16.msra.mxu2 %v3003_v54 }
 0x1a6   :  { %v847_v22 = vadd.f32 %v846_v17, %v3323_v49  ;;  %1043 = vmatmul.bf16.gmra.mxu0 %v3281_v61  ;;  %1147 = vmatmul.bf16.gmra.mxu1 %v3283_v62  ;;  %v553_v10 = vmax.f32 %v372_v25, 0.0  ;;  %v554_v51 = vmax.f32 %v476_v35, 0.0 }
 0x1a7   :  { %2287 = vmatpush.bf16.msra.mxu3 %v3011_v13 }
 0x1a8   :  { %v951_v24 = vadd.f32 %v950_v30, %v847_v22 }
 0x1aa   :  { %v1245_v58 = vmax.f32 %v951_v24, 0.0 }
 0x1ab   :  { %v373_v36 = vpop.f32.mrf.mxu0  ;;  %v477_v37 = vpop.f32.mrf.mxu1 }
 0x1ac   :  { %v374_v39 = vadd.f32 %v373_v36, %v3181_v40  ;;  %v478_v9 = vadd.f32 %v477_v37, %v3183_v41 }
 0x1ad   :  { %v848_v45 = vpop.f32.mrf.mxu2  ;;  %v952_v50 = vpop.f32.mrf.mxu3 }
 0x1ae   :  { %v555_v53 = vmax.f32 %v374_v39, 0.0  ;;  %v556_v56 = vmax.f32 %v478_v9, 0.0  ;;  %v849_v61 = vadd.f32 %v848_v45, %v3323_v49 }
 0x1b0   :  { %v953_v62 = vadd.f32 %v952_v50, %v849_v61  ;;  %v3470_v57 = vpack.c.bf16 %v555_v53, %v553_v10  ;;  %v3472_v29 = vpack.c.bf16 %v556_v56, %v554_v51 }
 0x1b2   :  { %v1247_v32 = vmax.f32 %v953_v62, 0.0  ;;  %890 = vmatmul.bf16.gmra.mxu2 %v3470_v57  ;;  %994 = vmatmul.bf16.gmra.mxu3 %v3472_v29 }
 0x1b3   :  { %v376_v59 = vpop.f32.mrf.mxu0  ;;  %v480_v0 = vpop.f32.mrf.mxu1 }
 0x1b4   :  { %v3476_v1 = vpack.c.bf16 %v1247_v32, %v1245_v58  ;;  %v377_v55 = vadd.f32 %v376_v59, %v3181_v40  ;;  %v481_v17 = vadd.f32 %v480_v0, %v3183_v41  ;;  %v2986_v58 = vld [vmem:[#allocation5 + $0xb4] sm:$0xf]  ;;  %v2813_v32 = vld [vmem:[#allocation5 + $0xb8] sm:$0xf0]  ;;  %v3499_v59 = vperm.slane %v3314_v42, 1 }
 0x1b5   :  { %v851_v14 = vpop.f32.mrf.mxu2  ;;  %v955_v15 = vpop.f32.mrf.mxu3  ;;  %v2816_v0 = vor.u32 %v2986_v58, %v2813_v32 }
 0x1b6   :  { %v852_v4 = vadd.f32 %v851_v14, %v3323_v49  ;;  %1048 = vmatmul.bf16.gmra.mxu0 %v3296_v19  ;;  %1152 = vmatmul.bf16.gmra.mxu1 %v3298_v20  ;;  %v557_v24 = vmax.f32 %v377_v55, 0.0  ;;  %v558_v36 = vmax.f32 %v481_v17, 0.0 }
 0x1b7   :  { %1841 = vmatpush.bf16.msra.mxu1 %v2816_v0 }
 0x1b8   :  { %v956_v12 = vadd.f32 %v955_v15, %v852_v4 }
 0x1ba   :  { %v1249_v51 = vmax.f32 %v956_v12, 0.0 }
 0x1bb   :  { %v378_v30 = vpop.f32.mrf.mxu0  ;;  %v482_v22 = vpop.f32.mrf.mxu1 }
 0x1bc   :  { %v379_v19 = vadd.f32 %v378_v30, %v3181_v40  ;;  %v483_v20 = vadd.f32 %v482_v22, %v3183_v41  ;;  %v2970_v40 = vld [vmem:[#allocation5 + $0x34] sm:$0xf]  ;;  %v2749_v41 = vld [vmem:[#allocation5 + $0x38] sm:$0xf0] }
 0x1bd   :  { %v853_v25 = vpop.f32.mrf.mxu2  ;;  %v957_v35 = vpop.f32.mrf.mxu3  ;;  %v2752_v62 = vor.u32 %v2970_v40, %v2749_v41 }
 0x1be   :  { %v559_v37 = vmax.f32 %v379_v19, 0.0  ;;  %v560_v39 = vmax.f32 %v483_v20, 0.0  ;;  %v854_v9 = vadd.f32 %v853_v25, %v3323_v49 }
 0x1bf   :  { %1737 = vmatpush.bf16.msra.mxu0 %v2752_v62  ;;  %v3010_v62 = vld [vmem:[%s4097_s7 + $0x70] sm:$0xff] }
 0x1c0   :  { %v958_v10 = vadd.f32 %v957_v35, %v854_v9  ;;  %v3492_v45 = vpack.c.bf16 %v559_v37, %v557_v24  ;;  %v3494_v50 = vpack.c.bf16 %v560_v39, %v558_v36  ;;  %2288 = vmatpush.bf16.msra.mxu3 %v3010_v62 }
 0x1c2   :  { %v1251_v53 = vmax.f32 %v958_v10, 0.0  ;;  %895 = vmatmul.bf16.gmra.mxu2 %v3492_v45  ;;  %999 = vmatmul.bf16.gmra.mxu3 %v3494_v50 }
 0x1c3   :  { %v1014_v56 = vpop.f32.mrf.mxu0  ;;  %v1118_v61 = vpop.f32.mrf.mxu1 }
 0x1c4   :  { %v3501_v14 = vpack.c.bf16 %v1251_v53, %v1249_v51  ;;  %v1015_v54 = vadd.f32 %v1014_v56, %v3499_v59 }
 0x1c5   :  { %v856_v15 = vpop.f32.mrf.mxu2  ;;  %v960_v4 = vpop.f32.mrf.mxu3 }
 0x1c6   :  { %v857_v12 = vadd.f32 %v856_v15, %v3323_v49  ;;  %1053 = vmatmul.bf16.gmra.mxu0 %v3316_v46  ;;  %1157 = vmatmul.bf16.gmra.mxu1 %v3318_v47  ;;  %v1119_v42 = vadd.f32 %v1118_v61, %v1015_v54  ;;  %v3002_v61 = vld [vmem:[%s4097_s7 + $0x30] sm:$0xff] }
 0x1c7   :  { %2184 = vmatpush.bf16.msra.mxu2 %v3002_v61 }
 0x1c8   :  { %v961_v13 = vadd.f32 %v960_v4, %v857_v12  ;;  %v1214_v25 = vmax.f32 %v1119_v42, 0.0 }
 0x1ca   :  { %v1253_v46 = vmax.f32 %v961_v13, 0.0 }
 0x1cb   :  { %v1016_v55 = vpop.f32.mrf.mxu0  ;;  %v1120_v17 = vpop.f32.mrf.mxu1 }
 0x1cc   :  { %v1017_v30 = vadd.f32 %v1016_v55, %v3499_v59 }
 0x1cd   :  { %v858_v22 = vpop.f32.mrf.mxu2  ;;  %v962_v19 = vpop.f32.mrf.mxu3 }
 0x1ce   :  { %v1121_v20 = vadd.f32 %v1120_v17, %v1017_v30  ;;  %v859_v24 = vadd.f32 %v858_v22, %v3323_v49 }
 0x1d0   :  { %v1216_v35 = vmax.f32 %v1121_v20, 0.0  ;;  %v963_v36 = vadd.f32 %v962_v19, %v859_v24 }
 0x1d2   :  { %v3509_v37 = vpack.c.bf16 %v1216_v35, %v1214_v25  ;;  %v1255_v47 = vmax.f32 %v963_v36, 0.0  ;;  %1533 = vmatmul.bf16.vlgmr.msrb.gmra.mxu2 %v3348_v38 }
 0x1d3   :  { %v1019_v39 = vpop.f32.mrf.mxu0  ;;  %v1123_v9 = vpop.f32.mrf.mxu1 }
 0x1d4   :  { %1637 = vmatmul.bf16.vlgmr.msrb.gmra.mxu3 %v3509_v37  ;;  %v3513_v10 = vpack.c.bf16 %v1255_v47, %v1253_v46  ;;  %v1020_v41 = vadd.f32 %v1019_v39, %v3499_v59  ;;  %v2968_v47 = vld [vmem:[#allocation5 + $0x24] sm:$0xf]  ;;  %v2741_v39 = vld [vmem:[#allocation5 + $0x28] sm:$0xf0] }
 0x1d5   :  { %v861_v51 = vpop.f32.mrf.mxu2  ;;  %v965_v53 = vpop.f32.mrf.mxu3 }
 0x1d6   :  { %v862_v40 = vadd.f32 %v861_v51, %v3323_v49  ;;  %1058 = vmatmul.bf16.gmra.mxu0 %v3342_v27  ;;  %1162 = vmatmul.bf16.gmra.mxu1 %v3344_v28  ;;  %v1124_v0 = vadd.f32 %v1123_v9, %v1020_v41  ;;  %v2744_v9 = vor.u32 %v2968_v47, %v2741_v39  ;;  %v2984_v51 = vld [vmem:[#allocation5 + $0xa4] sm:$0xf] }
 0x1d8   :  { %v966_v56 = vadd.f32 %v965_v53, %v862_v40  ;;  %v1218_v54 = vmax.f32 %v1124_v0, 0.0  ;;  %v2805_v53 = vld [vmem:[#allocation5 + $0xa8] sm:$0xf0]  ;;  %1738 = vmatpush.bf16.msra.mxu0 %v2744_v9 }
 0x1da   :  { %v1257_v17 = vmax.f32 %v966_v56, 0.0  ;;  %v2808_v56 = vor.u32 %v2984_v51, %v2805_v53 }
 0x1db   :  { %v1021_v58 = vpop.f32.mrf.mxu0  ;;  %v1125_v32 = vpop.f32.mrf.mxu1 }
 0x1dc   :  { %v1022_v15 = vadd.f32 %v1021_v58, %v3499_v59  ;;  %1842 = vmatpush.bf16.msra.mxu1 %v2808_v56 }
 0x1dd   :  { %v863_v27 = vpop.f32.mrf.mxu2  ;;  %v967_v28 = vpop.f32.mrf.mxu3 }
 0x1de   :  { %v1126_v4 = vadd.f32 %v1125_v32, %v1022_v15  ;;  %v864_v12 = vadd.f32 %v863_v27, %v3323_v49 }
 0x1e0   :  { %v1220_v13 = vmax.f32 %v1126_v4, 0.0  ;;  %v968_v55 = vadd.f32 %v967_v28, %v864_v12 }
 0x1e2   :  { %v1259_v42 = vmax.f32 %v968_v55, 0.0  ;;  %1538 = vmatmul.bf16.gmra.mxu2 %v3364_v23  ;;  %v3528_v30 = vpack.c.bf16 %v1220_v13, %v1218_v54 }
 0x1e3   :  { %v1024_v22 = vpop.f32.mrf.mxu0  ;;  %v1128_v19 = vpop.f32.mrf.mxu1 }
 0x1e4   :  { %1642 = vmatmul.bf16.gmra.mxu3 %v3528_v30  ;;  %v3531_v20 = vpack.c.bf16 %v1259_v42, %v1257_v17  ;;  %v1025_v36 = vadd.f32 %v1024_v22, %v3499_v59 }
 0x1e5   :  { %v866_v24 = vpop.f32.mrf.mxu2  ;;  %v970_v25 = vpop.f32.mrf.mxu3 }
 0x1e6   :  { %v867_v35 = vadd.f32 %v866_v24, %v3323_v49  ;;  %1063 = vmatmul.bf16.gmra.mxu0 %v3358_v5  ;;  %1167 = vmatmul.bf16.gmra.mxu1 %v3360_v6  ;;  %v1129_v61 = vadd.f32 %v1128_v19, %v1025_v36 }
 0x1e8   :  { %v971_v46 = vadd.f32 %v970_v25, %v867_v35  ;;  %v1222_v0 = vmax.f32 %v1129_v61, 0.0  ;;  %v3001_v61 = vld [vmem:[%s4097_s7 + $0x28] sm:$0xff] }
 0x1e9   :  { %2185 = vmatpush.bf16.msra.mxu2 %v3001_v61 }
 0x1ea   :  { %v1261_v28 = vmax.f32 %v971_v46, 0.0 }
 0x1eb   :  { %v1026_v40 = vpop.f32.mrf.mxu0  ;;  %v1130_v41 = vpop.f32.mrf.mxu1 }
 0x1ec   :  { %v1027_v62 = vadd.f32 %v1026_v40, %v3499_v59 }
 0x1ed   :  { %v868_v58 = vpop.f32.mrf.mxu2  ;;  %v972_v32 = vpop.f32.mrf.mxu3 }
 0x1ee   :  { %v1131_v5 = vadd.f32 %v1130_v41, %v1027_v62  ;;  %v869_v6 = vadd.f32 %v868_v58, %v3323_v49  ;;  %v3009_v62 = vld [vmem:[%s4097_s7 + $0x68] sm:$0xff] }
 0x1ef   :  { %2289 = vmatpush.bf16.msra.mxu3 %v3009_v62 }
 0x1f0   :  { %v1224_v15 = vmax.f32 %v1131_v5, 0.0  ;;  %v973_v27 = vadd.f32 %v972_v32, %v869_v6 }
 0x1f2   :  { %v1263_v4 = vmax.f32 %v973_v27, 0.0  ;;  %1543 = vmatmul.bf16.gmra.mxu2 %v3380_v11  ;;  %v3540_v12 = vpack.c.bf16 %v1224_v15, %v1222_v0 }
 0x1f3   :  { %v1029_v54 = vpop.f32.mrf.mxu0  ;;  %v1133_v13 = vpop.f32.mrf.mxu1 }
 0x1f4   :  { %1647 = vmatmul.bf16.gmra.mxu3 %v3540_v12  ;;  %v3543_v55 = vpack.c.bf16 %v1263_v4, %v1261_v28  ;;  %v1030_v19 = vadd.f32 %v1029_v54, %v3499_v59  ;;  %v2966_v4 = vld [vmem:[#allocation5 + $0x14] sm:$0xf]  ;;  %v2733_v54 = vld [vmem:[#allocation5 + $0x18] sm:$0xf0] }
 0x1f5   :  { %v871_v17 = vpop.f32.mrf.mxu2  ;;  %v975_v42 = vpop.f32.mrf.mxu3 }
 0x1f6   :  { %v872_v22 = vadd.f32 %v871_v17, %v3323_v49  ;;  %1068 = vmatmul.bf16.gmra.mxu0 %v3374_v60  ;;  %1172 = vmatmul.bf16.gmra.mxu1 %v3376_v63  ;;  %v1134_v36 = vadd.f32 %v1133_v13, %v1030_v19 }
 0x1f8   :  { %v976_v24 = vadd.f32 %v975_v42, %v872_v22  ;;  %v1226_v53 = vmax.f32 %v1134_v36, 0.0  ;;  %v2736_v42 = vor.u32 %v2966_v4, %v2733_v54 }
 0x1fa   :  { %v1265_v56 = vmax.f32 %v976_v24, 0.0  ;;  %1739 = vmatpush.bf16.msra.mxu0 %v2736_v42 }
 0x1fb   :  { %v1031_v25 = vpop.f32.mrf.mxu0  ;;  %v1135_v35 = vpop.f32.mrf.mxu1 }
 0x1fc   :  { %v1032_v46 = vadd.f32 %v1031_v25, %v3499_v59 }
 0x1fd   :  { %v873_v47 = vpop.f32.mrf.mxu2  ;;  %v977_v39 = vpop.f32.mrf.mxu3 }
 0x1fe   :  { %v1136_v9 = vadd.f32 %v1135_v35, %v1032_v46  ;;  %v874_v51 = vadd.f32 %v873_v47, %v3323_v49  ;;  %v2982_v47 = vld [vmem:[#allocation5 + $0x94] sm:$0xf] }
 0x200   :  { %v1228_v40 = vmax.f32 %v1136_v9, 0.0  ;;  %v978_v41 = vadd.f32 %v977_v39, %v874_v51  ;;  %v2797_v39 = vld [vmem:[#allocation5 + $0x98] sm:$0xf0] }
 0x201   :  { %v2800_v9 = vor.u32 %v2982_v47, %v2797_v39 }
 0x202   :  { %v1267_v60 = vmax.f32 %v978_v41, 0.0  ;;  %1548 = vmatmul.bf16.gmra.mxu2 %v3396_v52  ;;  %v3552_v63 = vpack.c.bf16 %v1228_v40, %v1226_v53 }
 0x203   :  { %v1034_v58 = vpop.f32.mrf.mxu0  ;;  %v1138_v32 = vpop.f32.mrf.mxu1  ;;  %1843 = vmatpush.bf16.msra.mxu1 %v2800_v9  ;;  %v3000_v9 = vld [vmem:[%s4097_s7 + $0x20] sm:$0xff] }
 0x204   :  { %1652 = vmatmul.bf16.gmra.mxu3 %v3552_v63  ;;  %v3561_v5 = vpack.c.bf16 %v1267_v60, %v1265_v56  ;;  %v1035_v27 = vadd.f32 %v1034_v58, %v3499_v59  ;;  %2186 = vmatpush.bf16.msra.mxu2 %v3000_v9 }
 0x205   :  { %v876_v6 = vpop.f32.mrf.mxu2  ;;  %v980_v0 = vpop.f32.mrf.mxu3 }
 0x206   :  { %v877_v15 = vadd.f32 %v876_v6, %v3323_v49  ;;  %1073 = vmatmul.bf16.gmra.mxu0 %v3390_v43  ;;  %1177 = vmatmul.bf16.gmra.mxu1 %v3392_v44  ;;  %v1139_v22 = vadd.f32 %v1138_v32, %v1035_v27 }
 0x208   :  { %v981_v28 = vadd.f32 %v980_v0, %v877_v15  ;;  %v1230_v43 = vmax.f32 %v1139_v22, 0.0 }
 0x20a   :  { %v1269_v51 = vmax.f32 %v981_v28, 0.0 }
 0x20b   :  { %v1036_v13 = vpop.f32.mrf.mxu0  ;;  %v1140_v17 = vpop.f32.mrf.mxu1 }
 0x20c   :  { %v1037_v19 = vadd.f32 %v1036_v13, %v3499_v59 }
 0x20d   :  { %v878_v24 = vpop.f32.mrf.mxu2  ;;  %v982_v25 = vpop.f32.mrf.mxu3 }
 0x20e   :  { %v1141_v35 = vadd.f32 %v1140_v17, %v1037_v19  ;;  %v879_v36 = vadd.f32 %v878_v24, %v3323_v49 }
 0x210   :  { %v1232_v46 = vmax.f32 %v1141_v35, 0.0  ;;  %v983_v44 = vadd.f32 %v982_v25, %v879_v36 }
 0x212   :  { %v1271_v53 = vmax.f32 %v983_v44, 0.0  ;;  %1553 = vmatmul.bf16.gmra.mxu2 %v3412_v48  ;;  %v3570_v40 = vpack.c.bf16 %v1232_v46, %v1230_v43 }
 0x213   :  { %v1039_v41 = vpop.f32.mrf.mxu0  ;;  %v1143_v56 = vpop.f32.mrf.mxu1 }
 0x214   :  { %1657 = vmatmul.bf16.gmra.mxu3 %v3570_v40  ;;  %v3573_v60 = vpack.c.bf16 %v1271_v53, %v1269_v51  ;;  %v1040_v32 = vadd.f32 %v1039_v41, %v3499_v59  ;;  %v3008_v51 = vld [vmem:[%s4097_s7 + $0x60] sm:$0xff] }
 0x215   :  { %v881_v61 = vpop.f32.mrf.mxu2  ;;  %v985_v62 = vpop.f32.mrf.mxu3  ;;  %2290 = vmatpush.bf16.msra.mxu3 %v3008_v51 }
 0x216   :  { %v882_v58 = vadd.f32 %v881_v61, %v3323_v49  ;;  %1078 = vmatmul.bf16.gmra.mxu0 %v3406_v33  ;;  %1182 = vmatmul.bf16.gmra.mxu1 %v3408_v34  ;;  %v1144_v27 = vadd.f32 %v1143_v56, %v1040_v32 }
 0x218   :  { %v986_v6 = vadd.f32 %v985_v62, %v882_v58  ;;  %v1234_v42 = vmax.f32 %v1144_v27, 0.0 }
 0x21a   :  { %v1273_v24 = vmax.f32 %v986_v6, 0.0 }
 0x21b   :  { %v1041_v0 = vpop.f32.mrf.mxu0  ;;  %v1145_v15 = vpop.f32.mrf.mxu1 }
 0x21c   :  { %v1042_v28 = vadd.f32 %v1041_v0, %v3499_v59 }
 0x21d   :  { %v883_v4 = vpop.f32.mrf.mxu2  ;;  %v987_v54 = vpop.f32.mrf.mxu3 }
 0x21e   :  { %v1146_v13 = vadd.f32 %v1145_v15, %v1042_v28  ;;  %v884_v17 = vadd.f32 %v883_v4, %v3323_v49  ;;  %v2964_v4 = vld [vmem:[#allocation5 + $0x4] sm:$0xf] }
 0x220   :  { %v1236_v22 = vmax.f32 %v1146_v13, 0.0  ;;  %v988_v19 = vadd.f32 %v987_v54, %v884_v17  ;;  %v2725_v54 = vld [vmem:[#allocation5 + $0x8] sm:$0xf0] }
 0x222   :  { %v1275_v33 = vmax.f32 %v988_v19, 0.0  ;;  %1558 = vmatmul.bf16.gmra.mxu2 %v3428_v26  ;;  %v3582_v34 = vpack.c.bf16 %v1236_v22, %v1234_v42  ;;  %v2728_v42 = vor.u32 %v2964_v4, %v2725_v54  ;;  %v2980_v22 = vld [vmem:[#allocation5 + $0x84] sm:$0xf]  ;;  %v2789_v19 = vld [vmem:[#allocation5 + $0x88] sm:$0xf0] }
 0x223   :  { %v1044_v25 = vpop.f32.mrf.mxu0  ;;  %v1148_v35 = vpop.f32.mrf.mxu1 }
 0x224   :  { %1662 = vmatmul.bf16.gmra.mxu3 %v3582_v34  ;;  %v3585_v36 = vpack.c.bf16 %v1275_v33, %v1273_v24  ;;  %v1045_v47 = vadd.f32 %v1044_v25, %v3499_v59  ;;  %v2792_v24 = vor.u32 %v2980_v22, %v2789_v19  ;;  %1740 = vmatpush.bf16.msra.mxu0 %v2728_v42 }
 0x225   :  { %v886_v43 = vpop.f32.mrf.mxu2  ;;  %v990_v46 = vpop.f32.mrf.mxu3 }
 0x226   :  { %v887_v44 = vadd.f32 %v886_v43, %v3323_v49  ;;  %1083 = vmatmul.bf16.gmra.mxu0 %v3422_v18  ;;  %1187 = vmatmul.bf16.gmra.mxu1 %v3424_v31  ;;  %v1149_v56 = vadd.f32 %v1148_v35, %v1045_v47 }
 0x227   :  { %1844 = vmatpush.bf16.msra.mxu1 %v2792_v24 }
 0x228   :  { %v991_v39 = vadd.f32 %v990_v46, %v887_v44  ;;  %v1238_v32 = vmax.f32 %v1149_v56, 0.0 }
 0x22a   :  { %v1277_v15 = vmax.f32 %v991_v39, 0.0 }
 0x22b   :  { %v1046_v53 = vpop.f32.mrf.mxu0  ;;  %v1150_v41 = vpop.f32.mrf.mxu1 }
 0x22c   :  { %v1047_v61 = vadd.f32 %v1046_v53, %v3499_v59 }
 0x22d   :  { %v888_v18 = vpop.f32.mrf.mxu2  ;;  %v992_v31 = vpop.f32.mrf.mxu3 }
 0x22e   :  { %v1151_v62 = vadd.f32 %v1150_v41, %v1047_v61  ;;  %v889_v58 = vadd.f32 %v888_v18, %v3323_v49 }
 0x230   :  { %v1240_v6 = vmax.f32 %v1151_v62, 0.0  ;;  %v993_v0 = vadd.f32 %v992_v31, %v889_v58 }
 0x232   :  { %v1279_v27 = vmax.f32 %v993_v0, 0.0  ;;  %1563 = vmatmul.bf16.gmra.mxu2 %v3444_v21  ;;  %v3600_v28 = vpack.c.bf16 %v1240_v6, %v1238_v32 }
 0x233   :  { %v1049_v13 = vpop.f32.mrf.mxu0  ;;  %v1153_v17 = vpop.f32.mrf.mxu1 }
 0x234   :  { %1667 = vmatmul.bf16.gmra.mxu3 %v3600_v28  ;;  %v3603_v33 = vpack.c.bf16 %v1279_v27, %v1277_v15  ;;  %v1050_v46 = vadd.f32 %v1049_v13, %v3499_v59 }
 0x235   :  { %v891_v25 = vpop.f32.mrf.mxu2  ;;  %v995_v35 = vpop.f32.mrf.mxu3 }
 0x236   :  { %v892_v43 = vadd.f32 %v891_v25, %v3323_v49  ;;  %1088 = vmatmul.bf16.gmra.mxu0 %v3438_v2  ;;  %1192 = vmatmul.bf16.gmra.mxu1 %v3440_v3  ;;  %v1154_v9 = vadd.f32 %v1153_v17, %v1050_v46  ;;  %v3626_v46 = vld [vmem:[%s4096_s6] sm:$0x3] }
 0x238   :  { %v996_v44 = vadd.f32 %v995_v35, %v892_v43  ;;  %v1242_v18 = vmax.f32 %v1154_v9, 0.0 }
 0x23a   :  { %v1281_v2 = vmax.f32 %v996_v44, 0.0 }
 0x23b   :  { %v1051_v47 = vpop.f32.mrf.mxu0  ;;  %v1155_v39 = vpop.f32.mrf.mxu1 }
 0x23c   :  { %v1052_v51 = vadd.f32 %v1051_v47, %v3499_v59  ;;  %v2999_v47 = vld [vmem:[%s4097_s7 + $0x18] sm:$0xff] }
 0x23d   :  { %v893_v53 = vpop.f32.mrf.mxu2  ;;  %v997_v41 = vpop.f32.mrf.mxu3  ;;  %2187 = vmatpush.bf16.msra.mxu2 %v2999_v47 }
 0x23e   :  { %v1156_v56 = vadd.f32 %v1155_v39, %v1052_v51  ;;  %v894_v61 = vadd.f32 %v893_v53, %v3323_v49  ;;  %v3007_v39 = vld [vmem:[%s4097_s7 + $0x58] sm:$0xff]  ;;  %v3638_v53 = vperm.slane %v3626_v46, 0 }
 0x23f   :  { %2291 = vmatpush.bf16.msra.mxu3 %v3007_v39 }
 0x240   :  { %v1244_v31 = vmax.f32 %v1156_v56, 0.0  ;;  %v998_v62 = vadd.f32 %v997_v41, %v894_v61 }
 0x242   :  { %v1283_v58 = vmax.f32 %v998_v62, 0.0  ;;  %1568 = vmatmul.bf16.gmra.mxu2 %v3460_v16  ;;  %v3612_v3 = vpack.c.bf16 %v1244_v31, %v1242_v18 }
 0x243   :  { %v1054_v32 = vpop.f32.mrf.mxu0  ;;  %v1158_v6 = vpop.f32.mrf.mxu1 }
 0x244   :  { %1672 = vmatmul.bf16.gmra.mxu3 %v3612_v3  ;;  %v3615_v0 = vpack.c.bf16 %v1283_v58, %v1281_v2  ;;  %v1055_v54 = vadd.f32 %v1054_v32, %v3499_v59 }
 0x245   :  { %v896_v15 = vpop.f32.mrf.mxu2  ;;  %v1000_v27 = vpop.f32.mrf.mxu3 }
 0x246   :  { %v897_v4 = vadd.f32 %v896_v15, %v3323_v49  ;;  %1093 = vmatmul.bf16.gmra.mxu0 %v3454_v7  ;;  %1197 = vmatmul.bf16.gmra.mxu1 %v3456_v8  ;;  %v1159_v22 = vadd.f32 %v1158_v6, %v1055_v54 }
 0x248   :  { %v1001_v13 = vadd.f32 %v1000_v27, %v897_v4  ;;  %v1246_v7 = vmax.f32 %v1159_v22, 0.0 }
 0x24a   :  { %v1285_v9 = vmax.f32 %v1001_v13, 0.0 }
 0x24b   :  { %v1056_v17 = vpop.f32.mrf.mxu0  ;;  %v1160_v42 = vpop.f32.mrf.mxu1 }
 0x24c   :  { %v1057_v19 = vadd.f32 %v1056_v17, %v3499_v59 }
 0x24d   :  { %v898_v24 = vpop.f32.mrf.mxu2  ;;  %v1002_v43 = vpop.f32.mrf.mxu3 }
 0x24e   :  { %v1161_v25 = vadd.f32 %v1160_v42, %v1057_v19  ;;  %v899_v35 = vadd.f32 %v898_v24, %v3323_v49 }
 0x250   :  { %v1248_v8 = vmax.f32 %v1161_v25, 0.0  ;;  %v1003_v44 = vadd.f32 %v1002_v43, %v899_v35 }
 0x252   :  { %v1287_v51 = vmax.f32 %v1003_v44, 0.0  ;;  %1573 = vmatmul.bf16.gmra.mxu2 %v3476_v1  ;;  %v3635_v49 = vpack.c.bf16 %v1248_v8, %v1246_v7 }
 0x253   :  { %v1059_v41 = vpop.f32.mrf.mxu0  ;;  %v1163_v56 = vpop.f32.mrf.mxu1 }
 0x254   :  { %1677 = vmatmul.bf16.gmra.mxu3 %v3635_v49  ;;  %v3641_v61 = vpack.c.bf16 %v1287_v51, %v1285_v9  ;;  %v1060_v2 = vadd.f32 %v1059_v41, %v3499_v59 }
 0x255   :  { %v1534_v18 = vpop.f32.mrf.mxu2 }
 0x256   :  { %v1535_v31 = vadd.f32 %v1534_v18, %v3638_v53  ;;  %1098 = vmatmul.bf16.gmra.mxu0 %v3470_v57  ;;  %1202 = vmatmul.bf16.gmra.mxu1 %v3472_v29  ;;  %v1164_v15 = vadd.f32 %v1163_v56, %v1060_v2 }
 0x257   :  { %v1638_v62 = vpop.f32.mrf.mxu3 }
 0x258   :  { %v1639_v58 = vadd.f32 %v1638_v62, %v1535_v31  ;;  %v1250_v42 = vmax.f32 %v1164_v15, 0.0 }
 0x25a   :  { %v1941_v57 = vmax.f32 %v1639_v58, 0.0 }
 0x25b   :  { %v1061_v32 = vpop.f32.mrf.mxu0  ;;  %v1165_v6 = vpop.f32.mrf.mxu1 }
 0x25c   :  { %v1062_v27 = vadd.f32 %v1061_v32, %v3499_v59 }
 0x25d   :  { %v1536_v4 = vpop.f32.mrf.mxu2 }
 0x25e   :  { %v1166_v54 = vadd.f32 %v1165_v6, %v1062_v27  ;;  %v1537_v13 = vadd.f32 %v1536_v4, %v3638_v53  ;;  %v2998_v27 = vld [vmem:[%s4097_s7 + $0x10] sm:$0xff] }
 0x25f   :  { %v1640_v17 = vpop.f32.mrf.mxu3  ;;  %v3006_v4 = vld [vmem:[%s4097_s7 + $0x50] sm:$0xff]  ;;  %2188 = vmatpush.bf16.msra.mxu2 %v2998_v27 }
 0x260   :  { %v1252_v22 = vmax.f32 %v1166_v54, 0.0  ;;  %v1641_v19 = vadd.f32 %v1640_v17, %v1537_v13  ;;  %2292 = vmatpush.bf16.msra.mxu3 %v3006_v4 }
 0x262   :  { %v1943_v24 = vmax.f32 %v1641_v19, 0.0  ;;  %1578 = vmatmul.bf16.gmra.mxu2 %v3501_v14  ;;  %v3650_v29 = vpack.c.bf16 %v1252_v22, %v1250_v42 }
 0x263   :  { %v1064_v25 = vpop.f32.mrf.mxu0  ;;  %v1168_v35 = vpop.f32.mrf.mxu1 }
 0x264   :  { %v3652_v43 = vpack.c.bf16 %v1943_v24, %v1941_v57  ;;  %1682 = vmatmul.bf16.gmra.mxu3 %v3650_v29  ;;  %v1065_v47 = vadd.f32 %v1064_v25, %v3499_v59 }
 0x265   :  { %v1539_v7 = vpop.f32.mrf.mxu2 }
 0x266   :  { %v1540_v8 = vadd.f32 %v1539_v7, %v3638_v53  ;;  %1103 = vmatmul.bf16.gmra.mxu0 %v3492_v45  ;;  %1207 = vmatmul.bf16.gmra.mxu1 %v3494_v50  ;;  %v1169_v41 = vadd.f32 %v1168_v35, %v1065_v47 }
 0x267   :  { %v1643_v44 = vpop.f32.mrf.mxu3 }
 0x268   :  { %v1644_v39 = vadd.f32 %v1643_v44, %v1540_v8  ;;  %v1254_v58 = vmax.f32 %v1169_v41, 0.0 }
 0x26a   :  { %v1945_v45 = vmax.f32 %v1644_v39, 0.0 }
 0x26b   :  { %v1066_v9 = vpop.f32.mrf.mxu0  ;;  %v1170_v51 = vpop.f32.mrf.mxu1 }
 0x26c   :  { %v1067_v56 = vadd.f32 %v1066_v9, %v3499_v59 }
 0x26d   :  { %v1541_v18 = vpop.f32.mrf.mxu2 }
 0x26e   :  { %v1171_v31 = vadd.f32 %v1170_v51, %v1067_v56  ;;  %v1542_v62 = vadd.f32 %v1541_v18, %v3638_v53 }
 0x26f   :  { %v1645_v2 = vpop.f32.mrf.mxu3 }
 0x270   :  { %v1256_v32 = vmax.f32 %v1171_v31, 0.0  ;;  %v1646_v6 = vadd.f32 %v1645_v2, %v1542_v62 }
 0x272   :  { %v1947_v15 = vmax.f32 %v1646_v6, 0.0  ;;  %1583 = vmatmul.bf16.gmra.mxu2 %v3513_v10  ;;  %v3662_v50 = vpack.c.bf16 %v1256_v32, %v1254_v58 }
 0x273   :  { %v1069_v54 = vpop.f32.mrf.mxu0  ;;  %v1173_v13 = vpop.f32.mrf.mxu1 }
 0x274   :  { %1687 = vmatmul.bf16.gmra.mxu3 %v3662_v50  ;;  %v3671_v17 = vpack.c.bf16 %v1947_v15, %v1945_v45  ;;  %v1070_v57 = vadd.f32 %v1069_v54, %v3499_v59 }
 0x275   :  { %v1544_v42 = vpop.f32.mrf.mxu2 }
 0x276   :  { %v1545_v22 = vadd.f32 %v1544_v42, %v3638_v53  ;;  %1741 = vmatmul.bf16.vlgmr.msra.gmra.mxu0 %v3348_v38  ;;  %1845 = vmatmul.bf16.vlgmr.msra.gmra.mxu1 %v3509_v37  ;;  %v1174_v7 = vadd.f32 %v1173_v13, %v1070_v57 }
 0x277   :  { %v1648_v19 = vpop.f32.mrf.mxu3 }
 0x278   :  { %v1649_v24 = vadd.f32 %v1648_v19, %v1545_v22  ;;  %v1258_v51 = vmax.f32 %v1174_v7, 0.0 }
 0x27a   :  { %v1949_v38 = vmax.f32 %v1649_v24, 0.0 }
 0x27b   :  { %v1071_v25 = vpop.f32.mrf.mxu0  ;;  %v1175_v35 = vpop.f32.mrf.mxu1 }
 0x27c   :  { %v1072_v8 = vadd.f32 %v1071_v25, %v3499_v59 }
 0x27d   :  { %v1546_v44 = vpop.f32.mrf.mxu2 }
 0x27e   :  { %v1176_v47 = vadd.f32 %v1175_v35, %v1072_v8  ;;  %v1547_v39 = vadd.f32 %v1546_v44, %v3638_v53 }
 0x27f   :  { %v1650_v9 = vpop.f32.mrf.mxu3 }
 0x280   :  { %v1260_v41 = vmax.f32 %v1176_v47, 0.0  ;;  %v1651_v56 = vadd.f32 %v1650_v9, %v1547_v39 }
 0x282   :  { %v1951_v18 = vmax.f32 %v1651_v56, 0.0  ;;  %1588 = vmatmul.bf16.gmra.mxu2 %v3531_v20  ;;  %v3680_v37 = vpack.c.bf16 %v1260_v41, %v1258_v51 }
 0x283   :  { %v1074_v31 = vpop.f32.mrf.mxu0  ;;  %v1178_v62 = vpop.f32.mrf.mxu1 }
 0x284   :  { %1692 = vmatmul.bf16.gmra.mxu3 %v3680_v37  ;;  %v3683_v2 = vpack.c.bf16 %v1951_v18, %v1949_v38  ;;  %v1075_v45 = vadd.f32 %v1074_v31, %v3499_v59  ;;  %v2997_v38 = vld [vmem:[%s4097_s7 + $0x8] sm:$0xff] }
 0x285   :  { %v1549_v58 = vpop.f32.mrf.mxu2  ;;  %v3005_v18 = vld [vmem:[%s4097_s7 + $0x48] sm:$0xff]  ;;  %2189 = vmatpush.bf16.msra.mxu2 %v2997_v38 }
 0x286   :  { %v1550_v32 = vadd.f32 %v1549_v58, %v3638_v53  ;;  %1746 = vmatmul.bf16.gmra.mxu0 %v3364_v23  ;;  %1850 = vmatmul.bf16.gmra.mxu1 %v3528_v30  ;;  %v1179_v54 = vadd.f32 %v1178_v62, %v1075_v45 }
 0x287   :  { %v1653_v6 = vpop.f32.mrf.mxu3  ;;  %2293 = vmatpush.bf16.msra.mxu3 %v3005_v18 }
 0x288   :  { %v1654_v15 = vadd.f32 %v1653_v6, %v1550_v32  ;;  %v1262_v24 = vmax.f32 %v1179_v54, 0.0 }
 0x28a   :  { %v1953_v23 = vmax.f32 %v1654_v15, 0.0 }
 0x28b   :  { %v1076_v27 = vpop.f32.mrf.mxu0  ;;  %v1180_v4 = vpop.f32.mrf.mxu1 }
 0x28c   :  { %v1077_v13 = vadd.f32 %v1076_v27, %v3499_v59 }
 0x28d   :  { %v1551_v42 = vpop.f32.mrf.mxu2 }
 0x28e   :  { %v1181_v22 = vadd.f32 %v1180_v4, %v1077_v13  ;;  %v1552_v19 = vadd.f32 %v1551_v42, %v3638_v53 }
 0x28f   :  { %v1655_v57 = vpop.f32.mrf.mxu3 }
 0x290   :  { %v1264_v25 = vmax.f32 %v1181_v22, 0.0  ;;  %v1656_v35 = vadd.f32 %v1655_v57, %v1552_v19 }
 0x292   :  { %v1955_v7 = vmax.f32 %v1656_v35, 0.0  ;;  %1593 = vmatmul.bf16.gmra.mxu2 %v3543_v55  ;;  %v3692_v30 = vpack.c.bf16 %v1264_v25, %v1262_v24 }
 0x293   :  { %v1079_v8 = vpop.f32.mrf.mxu0  ;;  %v1183_v44 = vpop.f32.mrf.mxu1 }
 0x294   :  { %1697 = vmatmul.bf16.gmra.mxu3 %v3692_v30  ;;  %v3695_v47 = vpack.c.bf16 %v1955_v7, %v1953_v23  ;;  %v1080_v41 = vadd.f32 %v1079_v8, %v3499_v59 }
 0x295   :  { %v1554_v39 = vpop.f32.mrf.mxu2 }
 0x296   :  { %v1555_v9 = vadd.f32 %v1554_v39, %v3638_v53  ;;  %1751 = vmatmul.bf16.gmra.mxu0 %v3380_v11  ;;  %1855 = vmatmul.bf16.gmra.mxu1 %v3540_v12  ;;  %v1184_v58 = vadd.f32 %v1183_v44, %v1080_v41 }
 0x297   :  { %v1658_v51 = vpop.f32.mrf.mxu3 }
 0x298   :  { %v1659_v56 = vadd.f32 %v1658_v51, %v1555_v9  ;;  %v1266_v15 = vmax.f32 %v1184_v58, 0.0 }
 0x29a   :  { %v1957_v54 = vmax.f32 %v1659_v56, 0.0 }
 0x29b   :  { %v1081_v31 = vpop.f32.mrf.mxu0  ;;  %v1185_v62 = vpop.f32.mrf.mxu1 }
 0x29c   :  { %v1082_v32 = vadd.f32 %v1081_v31, %v3499_v59 }
 0x29d   :  { %v1556_v11 = vpop.f32.mrf.mxu2 }
 0x29e   :  { %v1186_v12 = vadd.f32 %v1185_v62, %v1082_v32  ;;  %v1557_v6 = vadd.f32 %v1556_v11, %v3638_v53 }
 0x29f   :  { %v1660_v45 = vpop.f32.mrf.mxu3 }
 0x2a0   :  { %v1268_v27 = vmax.f32 %v1186_v12, 0.0  ;;  %v1661_v4 = vadd.f32 %v1660_v45, %v1557_v6 }
 0x2a2   :  { %v1959_v13 = vmax.f32 %v1661_v4, 0.0  ;;  %1598 = vmatmul.bf16.gmra.mxu2 %v3561_v5  ;;  %v3710_v42 = vpack.c.bf16 %v1268_v27, %v1266_v15 }
 0x2a3   :  { %v1084_v22 = vpop.f32.mrf.mxu0  ;;  %v1188_v19 = vpop.f32.mrf.mxu1 }
 0x2a4   :  { %1702 = vmatmul.bf16.gmra.mxu3 %v3710_v42  ;;  %v3713_v57 = vpack.c.bf16 %v1959_v13, %v1957_v54  ;;  %v1085_v23 = vadd.f32 %v1084_v22, %v3499_v59 }
 0x2a5   :  { %v1559_v24 = vpop.f32.mrf.mxu2 }
 0x2a6   :  { %v1560_v25 = vadd.f32 %v1559_v24, %v3638_v53  ;;  %1756 = vmatmul.bf16.gmra.mxu0 %v3396_v52  ;;  %1860 = vmatmul.bf16.gmra.mxu1 %v3552_v63  ;;  %v1189_v39 = vadd.f32 %v1188_v19, %v1085_v23 }
 0x2a7   :  { %v1663_v35 = vpop.f32.mrf.mxu3 }
 0x2a8   :  { %v1664_v7 = vadd.f32 %v1663_v35, %v1560_v25  ;;  %v1270_v18 = vmax.f32 %v1189_v39, 0.0 }
 0x2aa   :  { %v1961_v52 = vmax.f32 %v1664_v7, 0.0 }
 0x2ab   :  { %v1086_v8 = vpop.f32.mrf.mxu0  ;;  %v1190_v44 = vpop.f32.mrf.mxu1 }
 0x2ac   :  { %v1087_v9 = vadd.f32 %v1086_v8, %v3499_v59 }
 0x2ad   :  { %v1561_v51 = vpop.f32.mrf.mxu2 }
 0x2ae   :  { %v1191_v41 = vadd.f32 %v1190_v44, %v1087_v9  ;;  %v1562_v56 = vadd.f32 %v1561_v51, %v3638_v53 }
 0x2af   :  { %v1665_v38 = vpop.f32.mrf.mxu3 }
 0x2b0   :  { %v1272_v31 = vmax.f32 %v1191_v41, 0.0  ;;  %v1666_v62 = vadd.f32 %v1665_v38, %v1562_v56 }
 0x2b2   :  { %v1963_v58 = vmax.f32 %v1666_v62, 0.0  ;;  %1603 = vmatmul.bf16.gmra.mxu2 %v3573_v60  ;;  %v3722_v63 = vpack.c.bf16 %v1272_v31, %v1270_v18 }
 0x2b3   :  { %v1089_v32 = vpop.f32.mrf.mxu0  ;;  %v1193_v11 = vpop.f32.mrf.mxu1 }
 0x2b4   :  { %1707 = vmatmul.bf16.gmra.mxu3 %v3722_v63  ;;  %v3725_v12 = vpack.c.bf16 %v1963_v58, %v1961_v52  ;;  %v1090_v27 = vadd.f32 %v1089_v32, %v3499_v59 }
 0x2b5   :  { %v1564_v6 = vpop.f32.mrf.mxu2 }
 0x2b6   :  { %v1565_v45 = vadd.f32 %v1564_v6, %v3638_v53  ;;  %1761 = vmatmul.bf16.gmra.mxu0 %v3412_v48  ;;  %1865 = vmatmul.bf16.gmra.mxu1 %v3570_v40  ;;  %v1194_v22 = vadd.f32 %v1193_v11, %v1090_v27  ;;  %v2996_v48 = vld [vmem:[%s4097_s7] sm:$0xff] }
 0x2b7   :  { %v1668_v15 = vpop.f32.mrf.mxu3  ;;  %v3004_v40 = vld [vmem:[%s4097_s7 + $0x40] sm:$0xff]  ;;  %2190 = vmatpush.bf16.msra.mxu2 %v2996_v48 }
 0x2b8   :  { %v1669_v4 = vadd.f32 %v1668_v15, %v1565_v45  ;;  %v1274_v7 = vmax.f32 %v1194_v22, 0.0  ;;  %2294 = vmatpush.bf16.msra.mxu3 %v3004_v40 }
 0x2ba   :  { %v1965_v39 = vmax.f32 %v1669_v4, 0.0 }
 0x2bb   :  { %v1091_v54 = vpop.f32.mrf.mxu0  ;;  %v1195_v13 = vpop.f32.mrf.mxu1 }
 0x2bc   :  { %v1092_v19 = vadd.f32 %v1091_v54, %v3499_v59 }
 0x2bd   :  { %v1566_v24 = vpop.f32.mrf.mxu2 }
 0x2be   :  { %v1196_v25 = vadd.f32 %v1195_v13, %v1092_v19  ;;  %v1567_v35 = vadd.f32 %v1566_v24, %v3638_v53 }
 0x2bf   :  { %v1670_v23 = vpop.f32.mrf.mxu3 }
 0x2c0   :  { %v1276_v8 = vmax.f32 %v1196_v25, 0.0  ;;  %v1671_v44 = vadd.f32 %v1670_v23, %v1567_v35 }
 0x2c2   :  { %v1967_v9 = vmax.f32 %v1671_v44, 0.0  ;;  %1608 = vmatmul.bf16.gmra.mxu2 %v3585_v36  ;;  %v3740_v51 = vpack.c.bf16 %v1276_v8, %v1274_v7 }
 0x2c3   :  { %v1094_v41 = vpop.f32.mrf.mxu0  ;;  %v1198_v56 = vpop.f32.mrf.mxu1 }
 0x2c4   :  { %1712 = vmatmul.bf16.gmra.mxu3 %v3740_v51  ;;  %v3743_v38 = vpack.c.bf16 %v1967_v9, %v1965_v39  ;;  %v1095_v52 = vadd.f32 %v1094_v41, %v3499_v59 }
 0x2c5   :  { %v1569_v18 = vpop.f32.mrf.mxu2 }
 0x2c6   :  { %v1570_v31 = vadd.f32 %v1569_v18, %v3638_v53  ;;  %1766 = vmatmul.bf16.gmra.mxu0 %v3428_v26  ;;  %1870 = vmatmul.bf16.gmra.mxu1 %v3582_v34  ;;  %v1199_v6 = vadd.f32 %v1198_v56, %v1095_v52 }
 0x2c7   :  { %v1673_v62 = vpop.f32.mrf.mxu3 }
 0x2c8   :  { %v1674_v58 = vadd.f32 %v1673_v62, %v1570_v31  ;;  %v1278_v13 = vmax.f32 %v1199_v6, 0.0 }
 0x2ca   :  { %v1969_v26 = vmax.f32 %v1674_v58, 0.0 }
 0x2cb   :  { %v1096_v32 = vpop.f32.mrf.mxu0  ;;  %v1200_v11 = vpop.f32.mrf.mxu1 }
 0x2cc   :  { %v1097_v45 = vadd.f32 %v1096_v32, %v3499_v59 }
 0x2cd   :  { %v1571_v15 = vpop.f32.mrf.mxu2 }
 0x2ce   :  { %v1201_v27 = vadd.f32 %v1200_v11, %v1097_v45  ;;  %v1572_v4 = vadd.f32 %v1571_v15, %v3638_v53 }
 0x2cf   :  { %v1675_v54 = vpop.f32.mrf.mxu3 }
 0x2d0   :  { %v1280_v22 = vmax.f32 %v1201_v27, 0.0  ;;  %v1676_v19 = vadd.f32 %v1675_v54, %v1572_v4 }
 0x2d2   :  { %v1971_v24 = vmax.f32 %v1676_v19, 0.0  ;;  %1613 = vmatmul.bf16.gmra.mxu2 %v3603_v33  ;;  %v3752_v34 = vpack.c.bf16 %v1280_v22, %v1278_v13 }
 0x2d3   :  { %v1099_v25 = vpop.f32.mrf.mxu0  ;;  %v1203_v35 = vpop.f32.mrf.mxu1 }
 0x2d4   :  { %1717 = vmatmul.bf16.gmra.mxu3 %v3752_v34  ;;  %v3755_v23 = vpack.c.bf16 %v1971_v24, %v1969_v26  ;;  %v1100_v48 = vadd.f32 %v1099_v25, %v3499_v59 }
 0x2d5   :  { %v1574_v7 = vpop.f32.mrf.mxu2 }
 0x2d6   :  { %v1575_v8 = vadd.f32 %v1574_v7, %v3638_v53  ;;  %1771 = vmatmul.bf16.gmra.mxu0 %v3444_v21  ;;  %1875 = vmatmul.bf16.gmra.mxu1 %v3600_v28  ;;  %v1204_v41 = vadd.f32 %v1203_v35, %v1100_v48 }
 0x2d7   :  { %v1678_v44 = vpop.f32.mrf.mxu3 }
 0x2d8   :  { %v1679_v40 = vadd.f32 %v1678_v44, %v1575_v8  ;;  %v1282_v58 = vmax.f32 %v1204_v41, 0.0 }
 0x2da   :  { %v1973_v21 = vmax.f32 %v1679_v40, 0.0 }
 0x2db   :  { %v1101_v39 = vpop.f32.mrf.mxu0  ;;  %v1205_v9 = vpop.f32.mrf.mxu1 }
 0x2dc   :  { %v1102_v56 = vadd.f32 %v1101_v39, %v3499_v59 }
 0x2dd   :  { %v1576_v18 = vpop.f32.mrf.mxu2 }
 0x2de   :  { %v1206_v31 = vadd.f32 %v1205_v9, %v1102_v56  ;;  %v1577_v62 = vadd.f32 %v1576_v18, %v3638_v53 }
 0x2df   :  { %v1680_v52 = vpop.f32.mrf.mxu3 }
 0x2e0   :  { %v1284_v32 = vmax.f32 %v1206_v31, 0.0  ;;  %v1681_v11 = vadd.f32 %v1680_v52, %v1577_v62  ;;  %v3779_v31 = vperm.slane %v3626_v46, 1 }
 0x2e2   :  { %v1975_v6 = vmax.f32 %v1681_v11, 0.0  ;;  %1618 = vmatmul.bf16.gmra.mxu2 %v3615_v0  ;;  %v3764_v28 = vpack.c.bf16 %v1284_v32, %v1282_v58 }
 0x2e3   :  { %v1104_v45 = vpop.f32.mrf.mxu0  ;;  %v1208_v15 = vpop.f32.mrf.mxu1 }
 0x2e4   :  { %1722 = vmatmul.bf16.gmra.mxu3 %v3764_v28  ;;  %v3767_v27 = vpack.c.bf16 %v1975_v6, %v1973_v21  ;;  %v1105_v22 = vadd.f32 %v1104_v45, %v3499_v59 }
 0x2e5   :  { %v1579_v4 = vpop.f32.mrf.mxu2 }
 0x2e6   :  { %v1580_v54 = vadd.f32 %v1579_v4, %v3638_v53  ;;  %1776 = vmatmul.bf16.gmra.mxu0 %v3460_v16  ;;  %1880 = vmatmul.bf16.gmra.mxu1 %v3612_v3  ;;  %v1209_v25 = vadd.f32 %v1208_v15, %v1105_v22 }
 0x2e7   :  { %v1683_v13 = vpop.f32.mrf.mxu3 }
 0x2e8   :  { %v1684_v19 = vadd.f32 %v1683_v13, %v1580_v54  ;;  %v1286_v40 = vmax.f32 %v1209_v25, 0.0 }
 0x2ea   :  { %v1977_v16 = vmax.f32 %v1684_v19, 0.0 }
 0x2eb   :  { %v1106_v26 = vpop.f32.mrf.mxu0  ;;  %v1210_v24 = vpop.f32.mrf.mxu1 }
 0x2ec   :  { %v1107_v35 = vadd.f32 %v1106_v26, %v3499_v59 }
 0x2ed   :  { %v1581_v7 = vpop.f32.mrf.mxu2 }
 0x2ee   :  { %v1211_v8 = vadd.f32 %v1210_v24, %v1107_v35  ;;  %v1582_v44 = vadd.f32 %v1581_v7, %v3638_v53 }
 0x2ef   :  { %v1685_v48 = vpop.f32.mrf.mxu3 }
 0x2f0   :  { %v1288_v39 = vmax.f32 %v1211_v8, 0.0  ;;  %v1686_v9 = vadd.f32 %v1685_v48, %v1582_v44 }
 0x2f2   :  { %v1979_v41 = vmax.f32 %v1686_v9, 0.0  ;;  %1623 = vmatmul.bf16.gmra.mxu2 %v3641_v61  ;;  %v3776_v3 = vpack.c.bf16 %v1288_v39, %v1286_v40 }
 0x2f3   :  { %v1742_v56 = vpop.f32.mrf.mxu0  ;;  %v1846_v18 = vpop.f32.mrf.mxu1 }
 0x2f4   :  { %1727 = vmatmul.bf16.gmra.mxu3 %v3776_v3  ;;  %v3782_v59 = vpack.c.bf16 %v1979_v41, %v1977_v16  ;;  %v1743_v32 = vadd.f32 %v1742_v56, %v3779_v31 }
 0x2f5   :  { %v1584_v62 = vpop.f32.mrf.mxu2 }
 0x2f6   :  { %v1585_v52 = vadd.f32 %v1584_v62, %v3638_v53  ;;  %1781 = vmatmul.bf16.gmra.mxu0 %v3476_v1  ;;  %1885 = vmatmul.bf16.gmra.mxu1 %v3635_v49  ;;  %v1847_v45 = vadd.f32 %v1846_v18, %v1743_v32 }
 0x2f7   :  { %v1688_v58 = vpop.f32.mrf.mxu3 }
 0x2f8   :  { %v1689_v11 = vadd.f32 %v1688_v58, %v1585_v52  ;;  %v1942_v22 = vmax.f32 %v1847_v45, 0.0 }
 0x2fa   :  { %v1981_v1 = vmax.f32 %v1689_v11, 0.0 }
 0x2fb   :  { %v1744_v21 = vpop.f32.mrf.mxu0  ;;  %v1848_v6 = vpop.f32.mrf.mxu1 }
 0x2fc   :  { %v1745_v46 = vadd.f32 %v1744_v21, %v3779_v31 }
 0x2fd   :  { %v1586_v15 = vpop.f32.mrf.mxu2 }
 0x2fe   :  { %v1849_v4 = vadd.f32 %v1848_v6, %v1745_v46  ;;  %v1587_v54 = vadd.f32 %v1586_v15, %v3638_v53 }
 0x2ff   :  { %v1690_v13 = vpop.f32.mrf.mxu3 }
 0x300   :  { %v1944_v19 = vmax.f32 %v1849_v4, 0.0  ;;  %v1691_v26 = vadd.f32 %v1690_v13, %v1587_v54 }
 0x302   :  { %v2018_v24 = vpack.c.bf16 %v1944_v19, %v1942_v22  ;;  %v1983_v49 = vmax.f32 %v1691_v26, 0.0  ;;  %2191 = vmatmul.bf16.vlgmr.msra.gmra.mxu2 %v3652_v43 }
 0x303   :  { %v1747_v25 = vpop.f32.mrf.mxu0  ;;  %v1851_v35 = vpop.f32.mrf.mxu1 }
 0x304   :  { %2295 = vmatmul.bf16.vlgmr.msra.gmra.mxu3 %v2018_v24  ;;  %v3791_v7 = vpack.c.bf16 %v1983_v49, %v1981_v1  ;;  %v1748_v40 = vadd.f32 %v1747_v25, %v3779_v31 }
 0x305   :  { %v1589_v8 = vpop.f32.mrf.mxu2 }
 0x306   :  { %v1590_v44 = vadd.f32 %v1589_v8, %v3638_v53  ;;  %1786 = vmatmul.bf16.gmra.mxu0 %v3501_v14  ;;  %1890 = vmatmul.bf16.gmra.mxu1 %v3650_v29  ;;  %v1852_v41 = vadd.f32 %v1851_v35, %v1748_v40 }
 0x307   :  { %v1693_v48 = vpop.f32.mrf.mxu3 }
 0x308   :  { %v1694_v39 = vadd.f32 %v1693_v48, %v1590_v44  ;;  %v1946_v58 = vmax.f32 %v1852_v41, 0.0 }
 0x30a   :  { %v1985_v14 = vmax.f32 %v1694_v39, 0.0 }
 0x30b   :  { %v1749_v9 = vpop.f32.mrf.mxu0  ;;  %v1853_v16 = vpop.f32.mrf.mxu1 }
 0x30c   :  { %v1750_v43 = vadd.f32 %v1749_v9, %v3779_v31 }
 0x30d   :  { %v1591_v56 = vpop.f32.mrf.mxu2 }
 0x30e   :  { %v1854_v18 = vadd.f32 %v1853_v16, %v1750_v43  ;;  %v1592_v62 = vadd.f32 %v1591_v56, %v3638_v53 }
 0x30f   :  { %v1695_v52 = vpop.f32.mrf.mxu3 }
 0x310   :  { %v1948_v32 = vmax.f32 %v1854_v18, 0.0  ;;  %v1696_v11 = vadd.f32 %v1695_v52, %v1592_v62 }
 0x312   :  { %v1987_v21 = vmax.f32 %v1696_v11, 0.0  ;;  %2196 = vmatmul.bf16.gmra.mxu2 %v3671_v17  ;;  %v2020_v29 = vpack.c.bf16 %v1948_v32, %v1946_v58 }
 0x313   :  { %v1752_v6 = vpop.f32.mrf.mxu0  ;;  %v1856_v45 = vpop.f32.mrf.mxu1 }
 0x314   :  { %2300 = vmatmul.bf16.gmra.mxu3 %v2020_v29  ;;  %v3800_v46 = vpack.c.bf16 %v1987_v21, %v1985_v14  ;;  %v1753_v13 = vadd.f32 %v1752_v6, %v3779_v31 }
 0x315   :  { %v1594_v15 = vpop.f32.mrf.mxu2 }
 0x316   :  { %v1595_v4 = vadd.f32 %v1594_v15, %v3638_v53  ;;  %1791 = vmatmul.bf16.gmra.mxu0 %v3513_v10  ;;  %1895 = vmatmul.bf16.gmra.mxu1 %v3662_v50  ;;  %v1857_v17 = vadd.f32 %v1856_v45, %v1753_v13 }
 0x317   :  { %v1698_v54 = vpop.f32.mrf.mxu3 }
 0x318   :  { %v1699_v22 = vadd.f32 %v1698_v54, %v1595_v4  ;;  %v1950_v8 = vmax.f32 %v1857_v17, 0.0 }
 0x31a   :  { %v1989_v10 = vmax.f32 %v1699_v22, 0.0 }
 0x31b   :  { %v1754_v19 = vpop.f32.mrf.mxu0  ;;  %v1858_v26 = vpop.f32.mrf.mxu1 }
 0x31c   :  { %v1755_v1 = vadd.f32 %v1754_v19, %v3779_v31 }
 0x31d   :  { %v1596_v24 = vpop.f32.mrf.mxu2 }
 0x31e   :  { %v1859_v49 = vadd.f32 %v1858_v26, %v1755_v1  ;;  %v1597_v25 = vadd.f32 %v1596_v24, %v3638_v53 }
 0x31f   :  { %v1700_v35 = vpop.f32.mrf.mxu3 }
 0x320   :  { %v1952_v44 = vmax.f32 %v1859_v49, 0.0  ;;  %v1701_v48 = vadd.f32 %v1700_v35, %v1597_v25 }
 0x322   :  { %v1991_v40 = vmax.f32 %v1701_v48, 0.0  ;;  %2201 = vmatmul.bf16.gmra.mxu2 %v3683_v2  ;;  %v2022_v50 = vpack.c.bf16 %v1952_v44, %v1950_v8 }
 0x323   :  { %v1757_v39 = vpop.f32.mrf.mxu0  ;;  %v1861_v9 = vpop.f32.mrf.mxu1 }
 0x324   :  { %2305 = vmatmul.bf16.gmra.mxu3 %v2022_v50  ;;  %v3809_v16 = vpack.c.bf16 %v1991_v40, %v1989_v10  ;;  %v1758_v18 = vadd.f32 %v1757_v39, %v3779_v31 }
 0x325   :  { %v1599_v41 = vpop.f32.mrf.mxu2 }
 0x326   :  { %v1600_v43 = vadd.f32 %v1599_v41, %v3638_v53  ;;  %1796 = vmatmul.bf16.gmra.mxu0 %v3531_v20  ;;  %1900 = vmatmul.bf16.gmra.mxu1 %v3680_v37  ;;  %v1862_v2 = vadd.f32 %v1861_v9, %v1758_v18 }
 0x327   :  { %v1703_v56 = vpop.f32.mrf.mxu3 }
 0x328   :  { %v1704_v62 = vadd.f32 %v1703_v56, %v1600_v43  ;;  %v1954_v6 = vmax.f32 %v1862_v2, 0.0 }
 0x32a   :  { %v1993_v20 = vmax.f32 %v1704_v62, 0.0 }
 0x32b   :  { %v1759_v52 = vpop.f32.mrf.mxu0  ;;  %v1863_v58 = vpop.f32.mrf.mxu1 }
 0x32c   :  { %v1760_v32 = vadd.f32 %v1759_v52, %v3779_v31 }
 0x32d   :  { %v1601_v11 = vpop.f32.mrf.mxu2 }
 0x32e   :  { %v1864_v14 = vadd.f32 %v1863_v58, %v1760_v32  ;;  %v1602_v21 = vadd.f32 %v1601_v11, %v3638_v53 }
 0x32f   :  { %v1705_v29 = vpop.f32.mrf.mxu3 }
 0x330   :  { %v1956_v45 = vmax.f32 %v1864_v14, 0.0  ;;  %v1706_v15 = vadd.f32 %v1705_v29, %v1602_v21 }
 0x332   :  { %v1995_v4 = vmax.f32 %v1706_v15, 0.0  ;;  %2206 = vmatmul.bf16.gmra.mxu2 %v3695_v47  ;;  %v2024_v37 = vpack.c.bf16 %v1956_v45, %v1954_v6 }
 0x333   :  { %v1762_v54 = vpop.f32.mrf.mxu0  ;;  %v1866_v13 = vpop.f32.mrf.mxu1 }
 0x334   :  { %2310 = vmatmul.bf16.gmra.mxu3 %v2024_v37  ;;  %v3818_v22 = vpack.c.bf16 %v1995_v4, %v1993_v20  ;;  %v1763_v1 = vadd.f32 %v1762_v54, %v3779_v31 }
 0x335   :  { %v1604_v19 = vpop.f32.mrf.mxu2 }
 0x336   :  { %v1605_v26 = vadd.f32 %v1604_v19, %v3638_v53  ;;  %1801 = vmatmul.bf16.gmra.mxu0 %v3543_v55  ;;  %1905 = vmatmul.bf16.gmra.mxu1 %v3692_v30  ;;  %v1867_v47 = vadd.f32 %v1866_v13, %v1763_v1 }
 0x337   :  { %v1708_v17 = vpop.f32.mrf.mxu3 }
 0x338   :  { %v1709_v24 = vadd.f32 %v1708_v17, %v1605_v26  ;;  %v1958_v40 = vmax.f32 %v1867_v47, 0.0 }
 0x33a   :  { %v1997_v55 = vmax.f32 %v1709_v24, 0.0 }
 0x33b   :  { %v1764_v49 = vpop.f32.mrf.mxu0  ;;  %v1868_v25 = vpop.f32.mrf.mxu1 }
 0x33c   :  { %v1765_v35 = vadd.f32 %v1764_v49, %v3779_v31 }
 0x33d   :  { %v1606_v8 = vpop.f32.mrf.mxu2 }
 0x33e   :  { %v1869_v44 = vadd.f32 %v1868_v25, %v1765_v35  ;;  %v1607_v48 = vadd.f32 %v1606_v8, %v3638_v53 }
 0x33f   :  { %v1710_v10 = vpop.f32.mrf.mxu3 }
 0x340   :  { %v1960_v50 = vmax.f32 %v1869_v44, 0.0  ;;  %v1711_v39 = vadd.f32 %v1710_v10, %v1607_v48 }
 0x342   :  { %v1999_v9 = vmax.f32 %v1711_v39, 0.0  ;;  %2211 = vmatmul.bf16.gmra.mxu2 %v3713_v57  ;;  %v2026_v30 = vpack.c.bf16 %v1960_v50, %v1958_v40 }
 0x343   :  { %v1767_v41 = vpop.f32.mrf.mxu0  ;;  %v1871_v43 = vpop.f32.mrf.mxu1 }
 0x344   :  { %2315 = vmatmul.bf16.gmra.mxu3 %v2026_v30  ;;  %v3827_v56 = vpack.c.bf16 %v1999_v9, %v1997_v55  ;;  %v1768_v58 = vadd.f32 %v1767_v41, %v3779_v31 }
 0x345   :  { %v1609_v18 = vpop.f32.mrf.mxu2 }
 0x346   :  { %v1610_v62 = vadd.f32 %v1609_v18, %v3638_v53  ;;  %1806 = vmatmul.bf16.gmra.mxu0 %v3561_v5  ;;  %1910 = vmatmul.bf16.gmra.mxu1 %v3710_v42  ;;  %v1872_v57 = vadd.f32 %v1871_v43, %v1768_v58 }
 0x347   :  { %v1713_v52 = vpop.f32.mrf.mxu3 }
 0x348   :  { %v1714_v2 = vadd.f32 %v1713_v52, %v1610_v62  ;;  %v1962_v15 = vmax.f32 %v1872_v57, 0.0 }
 0x34a   :  { %v2001_v5 = vmax.f32 %v1714_v2, 0.0 }
 0x34b   :  { %v1769_v32 = vpop.f32.mrf.mxu0  ;;  %v1873_v11 = vpop.f32.mrf.mxu1 }
 0x34c   :  { %v1770_v14 = vadd.f32 %v1769_v32, %v3779_v31 }
 0x34d   :  { %v1611_v21 = vpop.f32.mrf.mxu2 }
 0x34e   :  { %v1874_v29 = vadd.f32 %v1873_v11, %v1770_v14  ;;  %v1612_v6 = vadd.f32 %v1611_v21, %v3638_v53 }
 0x34f   :  { %v1715_v45 = vpop.f32.mrf.mxu3 }
 0x350   :  { %v1964_v20 = vmax.f32 %v1874_v29, 0.0  ;;  %v1716_v4 = vadd.f32 %v1715_v45, %v1612_v6 }
 0x352   :  { %v2003_v37 = vmax.f32 %v1716_v4, 0.0  ;;  %2216 = vmatmul.bf16.gmra.mxu2 %v3725_v12  ;;  %v2028_v42 = vpack.c.bf16 %v1964_v20, %v1962_v15 }
 0x353   :  { %v1772_v54 = vpop.f32.mrf.mxu0  ;;  %v1876_v13 = vpop.f32.mrf.mxu1 }
 0x354   :  { %2320 = vmatmul.bf16.gmra.mxu3 %v2028_v42  ;;  %v3836_v19 = vpack.c.bf16 %v2003_v37, %v2001_v5  ;;  %v1773_v24 = vadd.f32 %v1772_v54, %v3779_v31 }
 0x355   :  { %v1614_v26 = vpop.f32.mrf.mxu2 }
 0x356   :  { %v1615_v17 = vadd.f32 %v1614_v26, %v3638_v53  ;;  %1811 = vmatmul.bf16.gmra.mxu0 %v3573_v60  ;;  %1915 = vmatmul.bf16.gmra.mxu1 %v3722_v63  ;;  %v1877_v12 = vadd.f32 %v1876_v13, %v1773_v24 }
 0x357   :  { %v1718_v1 = vpop.f32.mrf.mxu3 }
 0x358   :  { %v1719_v49 = vadd.f32 %v1718_v1, %v1615_v17  ;;  %v1966_v40 = vmax.f32 %v1877_v12, 0.0 }
 0x35a   :  { %v2005_v60 = vmax.f32 %v1719_v49, 0.0 }
 0x35b   :  { %v1774_v25 = vpop.f32.mrf.mxu0  ;;  %v1878_v47 = vpop.f32.mrf.mxu1 }
 0x35c   :  { %v1775_v35 = vadd.f32 %v1774_v25, %v3779_v31 }
 0x35d   :  { %v1616_v8 = vpop.f32.mrf.mxu2 }
 0x35e   :  { %v1879_v44 = vadd.f32 %v1878_v47, %v1775_v35  ;;  %v1617_v48 = vadd.f32 %v1616_v8, %v3638_v53 }
 0x35f   :  { %v1720_v10 = vpop.f32.mrf.mxu3 }
 0x360   :  { %v1968_v50 = vmax.f32 %v1879_v44, 0.0  ;;  %v1721_v39 = vadd.f32 %v1720_v10, %v1617_v48 }
 0x362   :  { %v2007_v55 = vmax.f32 %v1721_v39, 0.0  ;;  %2221 = vmatmul.bf16.gmra.mxu2 %v3743_v38  ;;  %v2030_v63 = vpack.c.bf16 %v1968_v50, %v1966_v40 }
 0x363   :  { %v1777_v9 = vpop.f32.mrf.mxu0  ;;  %v1881_v30 = vpop.f32.mrf.mxu1 }
 0x364   :  { %2325 = vmatmul.bf16.gmra.mxu3 %v2030_v63  ;;  %v3845_v41 = vpack.c.bf16 %v2007_v55, %v2005_v60  ;;  %v1778_v52 = vadd.f32 %v1777_v9, %v3779_v31 }
 0x365   :  { %v1619_v43 = vpop.f32.mrf.mxu2 }
 0x366   :  { %v1620_v18 = vadd.f32 %v1619_v43, %v3638_v53  ;;  %1816 = vmatmul.bf16.gmra.mxu0 %v3585_v36  ;;  %1920 = vmatmul.bf16.gmra.mxu1 %v3740_v51  ;;  %v1882_v38 = vadd.f32 %v1881_v30, %v1778_v52 }
 0x367   :  { %v1723_v62 = vpop.f32.mrf.mxu3 }
 0x368   :  { %v1724_v58 = vadd.f32 %v1723_v62, %v1620_v18  ;;  %v1970_v6 = vmax.f32 %v1882_v38, 0.0 }
 0x36a   :  { %v2009_v36 = vmax.f32 %v1724_v58, 0.0 }
 0x36b   :  { %v1779_v2 = vpop.f32.mrf.mxu0  ;;  %v1883_v32 = vpop.f32.mrf.mxu1 }
 0x36c   :  { %v1780_v11 = vadd.f32 %v1779_v2, %v3779_v31 }
 0x36d   :  { %v1621_v57 = vpop.f32.mrf.mxu2 }
 0x36e   :  { %v1884_v14 = vadd.f32 %v1883_v32, %v1780_v11  ;;  %v1622_v21 = vadd.f32 %v1621_v57, %v3638_v53 }
 0x36f   :  { %v1725_v29 = vpop.f32.mrf.mxu3 }
 0x370   :  { %v1972_v45 = vmax.f32 %v1884_v14, 0.0  ;;  %v1726_v15 = vadd.f32 %v1725_v29, %v1622_v21 }
 0x372   :  { %v2032_v20 = vpack.c.bf16 %v1972_v45, %v1970_v6  ;;  %v2011_v51 = vmax.f32 %v1726_v15, 0.0  ;;  %2226 = vmatmul.bf16.gmra.mxu2 %v3755_v23 }
 0x373   :  { %v1782_v4 = vpop.f32.mrf.mxu0  ;;  %v1886_v5 = vpop.f32.mrf.mxu1 }
 0x374   :  { %2330 = vmatmul.bf16.gmra.mxu3 %v2032_v20  ;;  %v3854_v37 = vpack.c.bf16 %v2011_v51, %v2009_v36  ;;  %v1783_v26 = vadd.f32 %v1782_v4, %v3779_v31 }
 0x375   :  { %v1624_v42 = vpop.f32.mrf.mxu2 }
 0x376   :  { %v1625_v54 = vadd.f32 %v1624_v42, %v3638_v53  ;;  %1821 = vmatmul.bf16.gmra.mxu0 %v3603_v33  ;;  %1925 = vmatmul.bf16.gmra.mxu1 %v3752_v34  ;;  %v1887_v49 = vadd.f32 %v1886_v5, %v1783_v26 }
 0x377   :  { %v1728_v13 = vpop.f32.mrf.mxu3 }
 0x378   :  { %v1729_v17 = vadd.f32 %v1728_v13, %v1625_v54  ;;  %v1974_v8 = vmax.f32 %v1887_v49, 0.0 }
 0x37a   :  { %v2013_v33 = vmax.f32 %v1729_v17, 0.0 }
 0x37b   :  { %v1784_v1 = vpop.f32.mrf.mxu0  ;;  %v1888_v24 = vpop.f32.mrf.mxu1 }
 0x37c   :  { %v1785_v23 = vadd.f32 %v1784_v1, %v3779_v31 }
 0x37d   :  { %v1626_v25 = vpop.f32.mrf.mxu2 }
 0x37e   :  { %v1889_v47 = vadd.f32 %v1888_v24, %v1785_v23  ;;  %v1627_v12 = vadd.f32 %v1626_v25, %v3638_v53  ;;  %v3867_v53 = vld [vmem:[#allocation2] ss:$0 sm:$0xff] }
 0x37f   :  { %v1730_v35 = vpop.f32.mrf.mxu3 }
 0x380   :  { %v1976_v44 = vmax.f32 %v1889_v47, 0.0  ;;  %v1731_v48 = vadd.f32 %v1730_v35, %v1627_v12 }
 0x382   :  { %v2034_v10 = vpack.c.bf16 %v1976_v44, %v1974_v8  ;;  %v2015_v34 = vmax.f32 %v1731_v48, 0.0  ;;  %2231 = vmatmul.bf16.gmra.mxu2 %v3767_v27 }
 0x383   :  { %v1787_v40 = vpop.f32.mrf.mxu0  ;;  %v1891_v50 = vpop.f32.mrf.mxu1 }
 0x384   :  { %2335 = vmatmul.bf16.gmra.mxu3 %v2034_v10  ;;  %v3863_v39 = vpack.c.bf16 %v2015_v34, %v2013_v33  ;;  %v1788_v63 = vadd.f32 %v1787_v40, %v3779_v31 }
 0x385   :  { %v2192_v60 = vpop.f32.mrf.mxu2 }
 0x386   :  { %1826 = vmatmul.bf16.gmra.mxu0 %v3615_v0  ;;  %1930 = vmatmul.bf16.gmra.mxu1 %v3764_v28  ;;  %v1892_v18 = vadd.f32 %v1891_v50, %v1788_v63 }
 0x387   :  { %v2296_v55 = vpop.f32.mrf.mxu3 }
 0x388   :  { %v2297_v9 = vadd.f32 %v2296_v55, %v2192_v60  ;;  %v1978_v58 = vmax.f32 %v1892_v18, 0.0 }
 0x38a   :  { %v2395_v30 = vadd.f32 %v3867_v53, %v2297_v9 }
 0x38b   :  { %v1789_v27 = vpop.f32.mrf.mxu0  ;;  %v1893_v43 = vpop.f32.mrf.mxu1 }
 0x38c   :  { %2434 = vst.msk [vmem:[%s4099_s9] sm:$0xff] %vm2433_vm2, %v2395_v30  ;;  %v1790_v0 = vadd.f32 %v1789_v27, %v3779_v31 }
 0x38d   :  { %v2194_v28 = vpop.f32.mrf.mxu2 }
 0x38e   :  { %v1894_v62 = vadd.f32 %v1893_v43, %v1790_v0 }
 0x38f   :  { %v2298_v52 = vpop.f32.mrf.mxu3 }
 0x390   :  { %v1980_v2 = vmax.f32 %v1894_v62, 0.0  ;;  %v2299_v32 = vadd.f32 %v2298_v52, %v2194_v28 }
 0x392   :  { %v2036_v38 = vpack.c.bf16 %v1980_v2, %v1978_v58  ;;  %v2396_v11 = vadd.f32 %v3867_v53, %v2299_v32  ;;  %2236 = vmatmul.bf16.gmra.mxu2 %v3782_v59 }
 0x393   :  { %v1792_v57 = vpop.f32.mrf.mxu0  ;;  %v1896_v14 = vpop.f32.mrf.mxu1 }
 0x394   :  { %2435 = vst.msk [vmem:[%s4099_s9 + $0x8] sm:$0xff] %vm2433_vm2, %v2396_v11  ;;  %2340 = vmatmul.bf16.gmra.mxu3 %v2036_v38  ;;  %v1793_v6 = vadd.f32 %v1792_v57, %v3779_v31 }
 0x395   :  { %v2197_v21 = vpop.f32.mrf.mxu2 }
 0x396   :  { %1831 = vmatmul.bf16.gmra.mxu0 %v3641_v61  ;;  %1935 = vmatmul.bf16.gmra.mxu1 %v3776_v3  ;;  %v1897_v20 = vadd.f32 %v1896_v14, %v1793_v6 }
 0x397   :  { %v2301_v29 = vpop.f32.mrf.mxu3 }
 0x398   :  { %v2302_v45 = vadd.f32 %v2301_v29, %v2197_v21  ;;  %v1982_v3 = vmax.f32 %v1897_v20, 0.0 }
 0x39a   :  { %v2397_v15 = vadd.f32 %v3867_v53, %v2302_v45 }
 0x39b   :  { %v1794_v59 = vpop.f32.mrf.mxu0  ;;  %v1898_v36 = vpop.f32.mrf.mxu1 }
 0x39c   :  { %2436 = vst.msk [vmem:[%s4099_s9 + $0x10] sm:$0xff] %vm2433_vm2, %v2397_v15  ;;  %v1795_v51 = vadd.f32 %v1794_v59, %v3779_v31 }
 0x39d   :  { %v2199_v4 = vpop.f32.mrf.mxu2 }
 0x39e   :  { %v1899_v61 = vadd.f32 %v1898_v36, %v1795_v51 }
 0x39f   :  { %v2303_v5 = vpop.f32.mrf.mxu3 }
 0x3a0   :  { %v1984_v42 = vmax.f32 %v1899_v61, 0.0  ;;  %v2304_v54 = vadd.f32 %v2303_v5, %v2199_v4 }
 0x3a2   :  { %v2038_v13 = vpack.c.bf16 %v1984_v42, %v1982_v3  ;;  %v2398_v26 = vadd.f32 %v3867_v53, %v2304_v54  ;;  %2241 = vmatmul.bf16.gmra.mxu2 %v3791_v7 }
 0x3a3   :  { %v1797_v17 = vpop.f32.mrf.mxu0  ;;  %v1901_v1 = vpop.f32.mrf.mxu1 }
 0x3a4   :  { %2437 = vst.msk [vmem:[%s4099_s9 + $0x18] sm:$0xff] %vm2433_vm2, %v2398_v26  ;;  %2345 = vmatmul.bf16.gmra.mxu3 %v2038_v13  ;;  %v1798_v23 = vadd.f32 %v1797_v17, %v3779_v31 }
 0x3a5   :  { %v2202_v24 = vpop.f32.mrf.mxu2 }
 0x3a6   :  { %v1902_v8 = vadd.f32 %v1901_v1, %v1798_v23 }
 0x3a7   :  { %v2306_v49 = vpop.f32.mrf.mxu3 }
 0x3a8   :  { %v2307_v25 = vadd.f32 %v2306_v49, %v2202_v24  ;;  %v1986_v10 = vmax.f32 %v1902_v8, 0.0 }
 0x3aa   :  { %v2399_v47 = vadd.f32 %v3867_v53, %v2307_v25 }
 0x3ab   :  { %v1799_v12 = vpop.f32.mrf.mxu0  ;;  %v1903_v35 = vpop.f32.mrf.mxu1 }
 0x3ac   :  { %2438 = vst.msk [vmem:[%s4099_s9 + $0x20] sm:$0xff] %vm2433_vm2, %v2399_v47  ;;  %v1800_v7 = vadd.f32 %v1799_v12, %v3779_v31 }
 0x3ad   :  { %v2204_v44 = vpop.f32.mrf.mxu2 }
 0x3ae   :  { %v1904_v48 = vadd.f32 %v1903_v35, %v1800_v7 }
 0x3af   :  { %v2308_v33 = vpop.f32.mrf.mxu3 }
 0x3b0   :  { %v1988_v34 = vmax.f32 %v1904_v48, 0.0  ;;  %v2309_v40 = vadd.f32 %v2308_v33, %v2204_v44 }
 0x3b2   :  { %v2040_v50 = vpack.c.bf16 %v1988_v34, %v1986_v10  ;;  %v2400_v60 = vadd.f32 %v3867_v53, %v2309_v40  ;;  %2246 = vmatmul.bf16.gmra.mxu2 %v3800_v46 }
 0x3b3   :  { %v1802_v55 = vpop.f32.mrf.mxu0  ;;  %v1906_v63 = vpop.f32.mrf.mxu1 }
 0x3b4   :  { %2439 = vst.msk [vmem:[%s4099_s9 + $0x28] sm:$0xff] %vm2433_vm2, %v2400_v60  ;;  %2350 = vmatmul.bf16.gmra.mxu3 %v2040_v50  ;;  %v1803_v27 = vadd.f32 %v1802_v55, %v3779_v31 }
 0x3b5   :  { %v2207_v9 = vpop.f32.mrf.mxu2 }
 0x3b6   :  { %v1907_v62 = vadd.f32 %v1906_v63, %v1803_v27 }
 0x3b7   :  { %v2311_v30 = vpop.f32.mrf.mxu3 }
 0x3b8   :  { %v2312_v43 = vadd.f32 %v2311_v30, %v2207_v9  ;;  %v1990_v32 = vmax.f32 %v1907_v62, 0.0 }
 0x3ba   :  { %v2401_v18 = vadd.f32 %v3867_v53, %v2312_v43 }
 0x3bb   :  { %v1804_v0 = vpop.f32.mrf.mxu0  ;;  %v1908_v28 = vpop.f32.mrf.mxu1 }
 0x3bc   :  { %2440 = vst.msk [vmem:[%s4099_s9 + $0x30] sm:$0xff] %vm2433_vm2, %v2401_v18  ;;  %v1805_v46 = vadd.f32 %v1804_v0, %v3779_v31 }
 0x3bd   :  { %v2209_v52 = vpop.f32.mrf.mxu2 }
 0x3be   :  { %v1909_v58 = vadd.f32 %v1908_v28, %v1805_v46 }
 0x3bf   :  { %v2313_v2 = vpop.f32.mrf.mxu3 }
 0x3c0   :  { %v1992_v38 = vmax.f32 %v1909_v58, 0.0  ;;  %v2314_v11 = vadd.f32 %v2313_v2, %v2209_v52 }
 0x3c2   :  { %v2042_v57 = vpack.c.bf16 %v1992_v38, %v1990_v32  ;;  %v2402_v14 = vadd.f32 %v3867_v53, %v2314_v11  ;;  %2251 = vmatmul.bf16.gmra.mxu2 %v3809_v16 }
 0x3c3   :  { %v1807_v21 = vpop.f32.mrf.mxu0  ;;  %v1911_v29 = vpop.f32.mrf.mxu1 }
 0x3c4   :  { %2441 = vst.msk [vmem:[%s4099_s9 + $0x38] sm:$0xff] %vm2433_vm2, %v2402_v14  ;;  %2355 = vmatmul.bf16.gmra.mxu3 %v2042_v57  ;;  %v1808_v15 = vadd.f32 %v1807_v21, %v3779_v31 }
 0x3c5   :  { %v2212_v6 = vpop.f32.mrf.mxu2 }
 0x3c6   :  { %v1912_v4 = vadd.f32 %v1911_v29, %v1808_v15 }
 0x3c7   :  { %v2316_v45 = vpop.f32.mrf.mxu3 }
 0x3c8   :  { %v2317_v59 = vadd.f32 %v2316_v45, %v2212_v6  ;;  %v1994_v42 = vmax.f32 %v1912_v4, 0.0 }
 0x3ca   :  { %v2403_v36 = vadd.f32 %v3867_v53, %v2317_v59 }
 0x3cb   :  { %v1809_v20 = vpop.f32.mrf.mxu0  ;;  %v1913_v51 = vpop.f32.mrf.mxu1 }
 0x3cc   :  { %2442 = vst.msk [vmem:[%s4099_s9 + $0x40] sm:$0xff] %vm2433_vm2, %v2403_v36  ;;  %v1810_v16 = vadd.f32 %v1809_v20, %v3779_v31 }
 0x3cd   :  { %v2214_v61 = vpop.f32.mrf.mxu2 }
 0x3ce   :  { %v1914_v5 = vadd.f32 %v1913_v51, %v1810_v16 }
 0x3cf   :  { %v2318_v3 = vpop.f32.mrf.mxu3 }
 0x3d0   :  { %v1996_v54 = vmax.f32 %v1914_v5, 0.0  ;;  %v2319_v13 = vadd.f32 %v2318_v3, %v2214_v61 }
 0x3d2   :  { %v2044_v26 = vpack.c.bf16 %v1996_v54, %v1994_v42  ;;  %v2404_v17 = vadd.f32 %v3867_v53, %v2319_v13  ;;  %2256 = vmatmul.bf16.gmra.mxu2 %v3818_v22 }
 0x3d3   :  { %v1812_v1 = vpop.f32.mrf.mxu0  ;;  %v1916_v24 = vpop.f32.mrf.mxu1 }
 0x3d4   :  { %2443 = vst.msk [vmem:[%s4099_s9 + $0x48] sm:$0xff] %vm2433_vm2, %v2404_v17  ;;  %2360 = vmatmul.bf16.gmra.mxu3 %v2044_v26  ;;  %v1813_v25 = vadd.f32 %v1812_v1, %v3779_v31 }
 0x3d5   :  { %v2217_v49 = vpop.f32.mrf.mxu2 }
 0x3d6   :  { %v1917_v7 = vadd.f32 %v1916_v24, %v1813_v25 }
 0x3d7   :  { %v2321_v23 = vpop.f32.mrf.mxu3 }
 0x3d8   :  { %v2322_v47 = vadd.f32 %v2321_v23, %v2217_v49  ;;  %v1998_v10 = vmax.f32 %v1917_v7, 0.0 }
 0x3da   :  { %v2405_v12 = vadd.f32 %v3867_v53, %v2322_v47 }
 0x3db   :  { %v1814_v35 = vpop.f32.mrf.mxu0  ;;  %v1918_v8 = vpop.f32.mrf.mxu1 }
 0x3dc   :  { %2444 = vst.msk [vmem:[%s4099_s9 + $0x50] sm:$0xff] %vm2433_vm2, %v2405_v12  ;;  %v1815_v22 = vadd.f32 %v1814_v35, %v3779_v31 }
 0x3dd   :  { %v2219_v44 = vpop.f32.mrf.mxu2 }
 0x3de   :  { %v1919_v48 = vadd.f32 %v1918_v8, %v1815_v22 }
 0x3df   :  { %v2323_v33 = vpop.f32.mrf.mxu3 }
 0x3e0   :  { %v2000_v34 = vmax.f32 %v1919_v48, 0.0  ;;  %v2324_v40 = vadd.f32 %v2323_v33, %v2219_v44 }
 0x3e2   :  { %v2046_v50 = vpack.c.bf16 %v2000_v34, %v1998_v10  ;;  %v2406_v60 = vadd.f32 %v3867_v53, %v2324_v40  ;;  %2261 = vmatmul.bf16.gmra.mxu2 %v3827_v56 }
 0x3e3   :  { %v1817_v55 = vpop.f32.mrf.mxu0  ;;  %v1921_v63 = vpop.f32.mrf.mxu1 }
 0x3e4   :  { %2445 = vst.msk [vmem:[%s4099_s9 + $0x58] sm:$0xff] %vm2433_vm2, %v2406_v60  ;;  %2365 = vmatmul.bf16.gmra.mxu3 %v2046_v50  ;;  %v1818_v27 = vadd.f32 %v1817_v55, %v3779_v31 }
 0x3e5   :  { %v2222_v9 = vpop.f32.mrf.mxu2 }
 0x3e6   :  { %v1922_v62 = vadd.f32 %v1921_v63, %v1818_v27 }
 0x3e7   :  { %v2326_v30 = vpop.f32.mrf.mxu3 }
 0x3e8   :  { %v2327_v43 = vadd.f32 %v2326_v30, %v2222_v9  ;;  %v2002_v2 = vmax.f32 %v1922_v62, 0.0 }
 0x3ea   :  { %v2407_v18 = vadd.f32 %v3867_v53, %v2327_v43 }
 0x3eb   :  { %v1819_v0 = vpop.f32.mrf.mxu0  ;;  %v1923_v28 = vpop.f32.mrf.mxu1 }
 0x3ec   :  { %2446 = vst.msk [vmem:[%s4099_s9 + $0x60] sm:$0xff] %vm2433_vm2, %v2407_v18  ;;  %v1820_v56 = vadd.f32 %v1819_v0, %v3779_v31 }
 0x3ed   :  { %v2224_v46 = vpop.f32.mrf.mxu2 }
 0x3ee   :  { %v1924_v52 = vadd.f32 %v1923_v28, %v1820_v56 }
 0x3ef   :  { %v2328_v58 = vpop.f32.mrf.mxu3 }
 0x3f0   :  { %v2004_v32 = vmax.f32 %v1924_v52, 0.0  ;;  %v2329_v38 = vadd.f32 %v2328_v58, %v2224_v46 }
 0x3f2   :  { %v2048_v11 = vpack.c.bf16 %v2004_v32, %v2002_v2  ;;  %v2408_v57 = vadd.f32 %v3867_v53, %v2329_v38  ;;  %2266 = vmatmul.bf16.gmra.mxu2 %v3836_v19 }
 0x3f3   :  { %v1822_v14 = vpop.f32.mrf.mxu0  ;;  %v1926_v21 = vpop.f32.mrf.mxu1 }
 0x3f4   :  { %2447 = vst.msk [vmem:[%s4099_s9 + $0x68] sm:$0xff] %vm2433_vm2, %v2408_v57  ;;  %2370 = vmatmul.bf16.gmra.mxu3 %v2048_v11  ;;  %v1823_v45 = vadd.f32 %v1822_v14, %v3779_v31 }
 0x3f5   :  { %v2227_v29 = vpop.f32.mrf.mxu2 }
 0x3f6   :  { %v1927_v51 = vadd.f32 %v1926_v21, %v1823_v45 }
 0x3f7   :  { %v2331_v6 = vpop.f32.mrf.mxu3 }
 0x3f8   :  { %v2332_v15 = vadd.f32 %v2331_v6, %v2227_v29  ;;  %v2006_v5 = vmax.f32 %v1927_v51, 0.0 }
 0x3fa   :  { %v2409_v59 = vadd.f32 %v3867_v53, %v2332_v15 }
 0x3fb   :  { %v1824_v36 = vpop.f32.mrf.mxu0  ;;  %v1928_v20 = vpop.f32.mrf.mxu1 }
 0x3fc   :  { %2448 = vst.msk [vmem:[%s4099_s9 + $0x70] sm:$0xff] %vm2433_vm2, %v2409_v59  ;;  %v1825_v19 = vadd.f32 %v1824_v36, %v3779_v31 }
 0x3fd   :  { %v2229_v4 = vpop.f32.mrf.mxu2 }
 0x3fe   :  { %v1929_v16 = vadd.f32 %v1928_v20, %v1825_v19 }
 0x3ff   :  { %v2333_v61 = vpop.f32.mrf.mxu3 }
 0x400   :  { %v2008_v3 = vmax.f32 %v1929_v16, 0.0  ;;  %v2334_v42 = vadd.f32 %v2333_v61, %v2229_v4 }
 0x402   :  { %v2050_v54 = vpack.c.bf16 %v2008_v3, %v2006_v5  ;;  %v2410_v13 = vadd.f32 %v3867_v53, %v2334_v42  ;;  %2271 = vmatmul.bf16.gmra.mxu2 %v3845_v41 }
 0x403   :  { %v1827_v26 = vpop.f32.mrf.mxu0  ;;  %v1931_v17 = vpop.f32.mrf.mxu1 }
 0x404   :  { %2449 = vst.msk [vmem:[%s4099_s9 + $0x78] sm:$0xff] %vm2433_vm2, %v2410_v13  ;;  %2375 = vmatmul.bf16.gmra.mxu3 %v2050_v54  ;;  %v1828_v49 = vadd.f32 %v1827_v26, %v3779_v31 }
 0x405   :  { %v2232_v1 = vpop.f32.mrf.mxu2 }
 0x406   :  { %v1932_v35 = vadd.f32 %v1931_v17, %v1828_v49 }
 0x407   :  { %v2336_v24 = vpop.f32.mrf.mxu3 }
 0x408   :  { %v2337_v23 = vadd.f32 %v2336_v24, %v2232_v1  ;;  %v2010_v44 = vmax.f32 %v1932_v35, 0.0 }
 0x40a   :  { %v2411_v25 = vadd.f32 %v3867_v53, %v2337_v23 }
 0x40b   :  { %v1829_v47 = vpop.f32.mrf.mxu0  ;;  %v1933_v12 = vpop.f32.mrf.mxu1 }
 0x40c   :  { %2450 = vst.msk [vmem:[%s4099_s9 + $0x80] sm:$0xff] %vm2433_vm2, %v2411_v25  ;;  %v1830_v41 = vadd.f32 %v1829_v47, %v3779_v31 }
 0x40d   :  { %v2234_v8 = vpop.f32.mrf.mxu2 }
 0x40e   :  { %v1934_v7 = vadd.f32 %v1933_v12, %v1830_v41 }
 0x40f   :  { %v2338_v22 = vpop.f32.mrf.mxu3 }
 0x410   :  { %v2012_v48 = vmax.f32 %v1934_v7, 0.0  ;;  %v2339_v33 = vadd.f32 %v2338_v22, %v2234_v8 }
 0x412   :  { %v2052_v10 = vpack.c.bf16 %v2012_v48, %v2010_v44  ;;  %v2412_v34 = vadd.f32 %v3867_v53, %v2339_v33  ;;  %2276 = vmatmul.bf16.gmra.mxu2 %v3854_v37 }
 0x413   :  { %v1832_v40 = vpop.f32.mrf.mxu0  ;;  %v1936_v50 = vpop.f32.mrf.mxu1 }
 0x414   :  { %2451 = vst.msk [vmem:[%s4099_s9 + $0x88] sm:$0xff] %vm2433_vm2, %v2412_v34  ;;  %2380 = vmatmul.bf16.gmra.mxu3 %v2052_v10  ;;  %v1833_v63 = vadd.f32 %v1832_v40, %v3779_v31 }
 0x415   :  { %v2237_v60 = vpop.f32.mrf.mxu2 }
 0x416   :  { %v1937_v43 = vadd.f32 %v1936_v50, %v1833_v63 }
 0x417   :  { %v2341_v55 = vpop.f32.mrf.mxu3 }
 0x418   :  { %v2342_v9 = vadd.f32 %v2341_v55, %v2237_v60  ;;  %v2014_v56 = vmax.f32 %v1937_v43, 0.0 }
 0x41a   :  { %v2413_v30 = vadd.f32 %v3867_v53, %v2342_v9 }
 0x41b   :  { %v1834_v27 = vpop.f32.mrf.mxu0  ;;  %v1938_v18 = vpop.f32.mrf.mxu1 }
 0x41c   :  { %2452 = vst.msk [vmem:[%s4099_s9 + $0x90] sm:$0xff] %vm2433_vm2, %v2413_v30  ;;  %v1835_v37 = vadd.f32 %v1834_v27, %v3779_v31 }
 0x41d   :  { %v2239_v0 = vpop.f32.mrf.mxu2 }
 0x41e   :  { %v1939_v28 = vadd.f32 %v1938_v18, %v1835_v37 }
 0x41f   :  { %v2343_v62 = vpop.f32.mrf.mxu3 }
 0x420   :  { %v2016_v46 = vmax.f32 %v1939_v28, 0.0  ;;  %v2344_v52 = vadd.f32 %v2343_v62, %v2239_v0 }
 0x422   :  { %v2054_v58 = vpack.c.bf16 %v2016_v46, %v2014_v56  ;;  %v2414_v2 = vadd.f32 %v3867_v53, %v2344_v52  ;;  %2281 = vmatmul.bf16.gmra.mxu2 %v3863_v39 }
 0x424   :  { %2453 = vst.msk [vmem:[%s4099_s9 + $0x98] sm:$0xff] %vm2433_vm2, %v2414_v2  ;;  %2385 = vmatmul.bf16.gmra.mxu3 %v2054_v58 }
 0x425   :  { %v2242_v32 = vpop.f32.mrf.mxu2 }
 0x427   :  { %v2346_v31 = vpop.f32.mrf.mxu3 }
 0x428   :  { %v2347_v38 = vadd.f32 %v2346_v31, %v2242_v32 }
 0x42a   :  { %v2415_v11 = vadd.f32 %v3867_v53, %v2347_v38 }
 0x42c   :  { %2454 = vst.msk [vmem:[%s4099_s9 + $0xa0] sm:$0xff] %vm2433_vm2, %v2415_v11 }
 0x42d   :  { %v2244_v57 = vpop.f32.mrf.mxu2 }
 0x42f   :  { %v2348_v14 = vpop.f32.mrf.mxu3 }
 0x430   :  { %v2349_v21 = vadd.f32 %v2348_v14, %v2244_v57 }
 0x432   :  { %v2416_v39 = vadd.f32 %v3867_v53, %v2349_v21 }
 0x434   :  { %2455 = vst.msk [vmem:[%s4099_s9 + $0xa8] sm:$0xff] %vm2433_vm2, %v2416_v39 }
 0x435   :  { %v2247_v29 = vpop.f32.mrf.mxu2 }
 0x437   :  { %v2351_v6 = vpop.f32.mrf.mxu3 }
 0x438   :  { %v2352_v45 = vadd.f32 %v2351_v6, %v2247_v29 }
 0x43a   :  { %v2417_v15 = vadd.f32 %v3867_v53, %v2352_v45 }
 0x43c   :  { %2456 = vst.msk [vmem:[%s4099_s9 + $0xb0] sm:$0xff] %vm2433_vm2, %v2417_v15 }
 0x43d   :  { %v2249_v59 = vpop.f32.mrf.mxu2 }
 0x43f   :  { %v2353_v36 = vpop.f32.mrf.mxu3 }
 0x440   :  { %v2354_v20 = vadd.f32 %v2353_v36, %v2249_v59 }
 0x442   :  { %v2418_v51 = vadd.f32 %v3867_v53, %v2354_v20 }
 0x444   :  { %2457 = vst.msk [vmem:[%s4099_s9 + $0xb8] sm:$0xff] %vm2433_vm2, %v2418_v51 }
 0x445   :  { %v2252_v19 = vpop.f32.mrf.mxu2 }
 0x447   :  { %v2356_v4 = vpop.f32.mrf.mxu3 }
 0x448   :  { %v2357_v16 = vadd.f32 %v2356_v4, %v2252_v19 }
 0x44a   :  { %v2419_v61 = vadd.f32 %v3867_v53, %v2357_v16 }
 0x44c   :  { %2458 = vst.msk [vmem:[%s4099_s9 + $0xc0] sm:$0xff] %vm2433_vm2, %v2419_v61 }
 0x44d   :  { %v2254_v5 = vpop.f32.mrf.mxu2 }
 0x44f   :  { %v2358_v3 = vpop.f32.mrf.mxu3 }
 0x450   :  { %v2359_v42 = vadd.f32 %v2358_v3, %v2254_v5 }
 0x452   :  { %v2420_v54 = vadd.f32 %v3867_v53, %v2359_v42 }
 0x454   :  { %2459 = vst.msk [vmem:[%s4099_s9 + $0xc8] sm:$0xff] %vm2433_vm2, %v2420_v54 }
 0x455   :  { %v2257_v13 = vpop.f32.mrf.mxu2 }
 0x457   :  { %v2361_v26 = vpop.f32.mrf.mxu3 }
 0x458   :  { %v2362_v17 = vadd.f32 %v2361_v26, %v2257_v13 }
 0x45a   :  { %v2421_v1 = vadd.f32 %v3867_v53, %v2362_v17 }
 0x45c   :  { %2460 = vst.msk [vmem:[%s4099_s9 + $0xd0] sm:$0xff] %vm2433_vm2, %v2421_v1 }
 0x45d   :  { %v2259_v24 = vpop.f32.mrf.mxu2 }
 0x45f   :  { %v2363_v49 = vpop.f32.mrf.mxu3 }
 0x460   :  { %v2364_v23 = vadd.f32 %v2363_v49, %v2259_v24 }
 0x462   :  { %v2422_v25 = vadd.f32 %v3867_v53, %v2364_v23 }
 0x464   :  { %2461 = vst.msk [vmem:[%s4099_s9 + $0xd8] sm:$0xff] %vm2433_vm2, %v2422_v25 }
 0x465   :  { %v2262_v47 = vpop.f32.mrf.mxu2 }
 0x467   :  { %v2366_v12 = vpop.f32.mrf.mxu3 }
 0x468   :  { %v2367_v35 = vadd.f32 %v2366_v12, %v2262_v47 }
 0x46a   :  { %v2423_v41 = vadd.f32 %v3867_v53, %v2367_v35 }
 0x46c   :  { %2462 = vst.msk [vmem:[%s4099_s9 + $0xe0] sm:$0xff] %vm2433_vm2, %v2423_v41 }
 0x46d   :  { %v2264_v8 = vpop.f32.mrf.mxu2 }
 0x46f   :  { %v2368_v7 = vpop.f32.mrf.mxu3 }
 0x470   :  { %v2369_v22 = vadd.f32 %v2368_v7, %v2264_v8 }
 0x472   :  { %v2424_v44 = vadd.f32 %v3867_v53, %v2369_v22 }
 0x474   :  { %2463 = vst.msk [vmem:[%s4099_s9 + $0xe8] sm:$0xff] %vm2433_vm2, %v2424_v44 }
 0x475   :  { %v2267_v48 = vpop.f32.mrf.mxu2 }
 0x477   :  { %v2371_v33 = vpop.f32.mrf.mxu3 }
 0x478   :  { %v2372_v10 = vadd.f32 %v2371_v33, %v2267_v48 }
 0x47a   :  { %v2425_v34 = vadd.f32 %v3867_v53, %v2372_v10 }
 0x47c   :  { %2464 = vst.msk [vmem:[%s4099_s9 + $0xf0] sm:$0xff] %vm2433_vm2, %v2425_v34 }
 0x47d   :  { %v2269_v40 = vpop.f32.mrf.mxu2 }
 0x47f   :  { %v2373_v50 = vpop.f32.mrf.mxu3 }
 0x480   :  { %v2374_v60 = vadd.f32 %v2373_v50, %v2269_v40 }
 0x482   :  { %v2426_v55 = vadd.f32 %v3867_v53, %v2374_v60 }
 0x484   :  { %2465 = vst.msk [vmem:[%s4099_s9 + $0xf8] sm:$0xff] %vm2433_vm2, %v2426_v55 }
 0x485   :  { %v2272_v63 = vpop.f32.mrf.mxu2 }
 0x487   :  { %v2376_v9 = vpop.f32.mrf.mxu3 }
 0x488   :  { %v2377_v30 = vadd.f32 %v2376_v9, %v2272_v63 }
 0x48a   :  { %v2427_v27 = vadd.f32 %v3867_v53, %v2377_v30 }
 0x48c   :  { %2466 = vst.msk [vmem:[%s4099_s9 + $0x100] sm:$0xff] %vm2433_vm2, %v2427_v27 }
 0x48d   :  { %v2274_v43 = vpop.f32.mrf.mxu2 }
 0x48f   :  { %v2378_v37 = vpop.f32.mrf.mxu3 }
 0x490   :  { %v2379_v18 = vadd.f32 %v2378_v37, %v2274_v43 }
 0x492   :  { %v2428_v0 = vadd.f32 %v3867_v53, %v2379_v18 }
 0x494   :  { %2467 = vst.msk [vmem:[%s4099_s9 + $0x108] sm:$0xff] %vm2433_vm2, %v2428_v0 }
 0x495   :  { %v2277_v28 = vpop.f32.mrf.mxu2 }
 0x497   :  { %v2381_v62 = vpop.f32.mrf.mxu3 }
 0x498   :  { %v2382_v56 = vadd.f32 %v2381_v62, %v2277_v28 }
 0x49a   :  { %v2429_v46 = vadd.f32 %v3867_v53, %v2382_v56 }
 0x49c   :  { %2468 = vst.msk [vmem:[%s4099_s9 + $0x110] sm:$0xff] %vm2433_vm2, %v2429_v46 }
 0x49d   :  { %v2279_v52 = vpop.f32.mrf.mxu2 }
 0x49f   :  { %v2383_v58 = vpop.f32.mrf.mxu3 }
 0x4a0   :  { %v2384_v2 = vadd.f32 %v2383_v58, %v2279_v52 }
 0x4a2   :  { %v2430_v32 = vadd.f32 %v3867_v53, %v2384_v2 }
 0x4a4   :  { %2469 = vst.msk [vmem:[%s4099_s9 + $0x118] sm:$0xff] %vm2433_vm2, %v2430_v32 }
 0x4a5   :  { %v2282_v31 = vpop.f32.mrf.mxu2 }
 0x4a7   :  { %v2386_v38 = vpop.f32.mrf.mxu3 }
 0x4a8   :  { %v2387_v11 = vadd.f32 %v2386_v38, %v2282_v31 }
 0x4aa   :  { %v2431_v57 = vadd.f32 %v3867_v53, %v2387_v11 }
 0x4ac   :  { %2470 = vst.msk [vmem:[%s4099_s9 + $0x120] sm:$0xff] %vm2433_vm2, %v2431_v57 }
 0x4ad   :  { %v2284_v14 = vpop.f32.mrf.mxu2 }
 0x4af   :  { %v2388_v21 = vpop.f32.mrf.mxu3 }
 0x4b0   :  { %v2389_v39 = vadd.f32 %v2388_v21, %v2284_v14 }
 0x4b2   :  { %v2432_v29 = vadd.f32 %v3867_v53, %v2389_v39 }
 0x4b4   :  { %2472 = vst.msk [vmem:[%s4099_s9 + $0x128] sm:$0xf] %vm2471_vm3, %v2432_v29 }
 0x4b5   :  { %2477 = vsyncpa [#allocation4], 1 }
 0x4b6   :  { %2478 = vsyncpa [#allocation6], 1 }

</bundles_post_ra>
